<compile_context>
chip_gen: v5e
topology: v5e:2x2
jax: 0.10.0
libtpu: 0.0.40
codegen_flags: <defaults>
</compile_context>

<pallas_src>
import functools

import jax
import jax.numpy as jnp
from jax.experimental import pallas as pl
from jax.experimental.pallas import tpu as pltpu


_LANE = 128
_NEG_INF = -1e30  # bias for padded class lanes -> exp() == 0 in log_softmax


def _rup(a, b):
    return (a + b - 1) // b * b


# ----------------------------------------------------------------------------
# Kernel 1: per-node AE branch + the [x@Wg1 | z@Wgd] slab (no adjacency).
# Grid: (node_row_tiles,). Weights are fully resident; x rows streamed.
# ----------------------------------------------------------------------------
def _node_kernel(x_ref, wxcat_ref, be_ref, wc_ref, bc_ref, wzcat_ref, bd_ref,
                 wx_ref, bx_ref,
                 xbar_ref, enc_ref, s_ref, *, p_enc, p_dec):
    cd = x_ref.dtype

    def mm(a, b):
        return jnp.dot(a.astype(cd), b, preferred_element_type=jnp.float32)

    # x @ [We | Wg1]  (one MXU matmul for both consumers of x)
    xcat = mm(x_ref[...], wxcat_ref[...])
    enc_h1 = jnp.maximum(xcat[:, :p_enc] + be_ref[...], 0.0)

    z = mm(enc_h1, wc_ref[...]) + bc_ref[...]

    # z @ [Wd | Wgd]  (one MXU matmul for both consumers of z)
    zcat = mm(z, wzcat_ref[...])
    dec_h1 = jnp.maximum(zcat[:, :p_dec] + bd_ref[...], 0.0)

    xbar_ref[...] = mm(dec_h1, wx_ref[...]) + bx_ref[...]
    enc_ref[...] = enc_h1

    # [x@Wg1 | z@Wgd] slab; GCN biases are added AFTER the adj aggregation.
    # Two lane-aligned stores (no unaligned concat).
    s_ref[:, :p_enc] = xcat[:, p_enc:].astype(s_ref.dtype)
    s_ref[:, p_enc:] = zcat[:, p_dec:].astype(s_ref.dtype)


# ----------------------------------------------------------------------------
# Kernel 2: first adj pass, fused gnn_1 + pred_node_degree, plus the mix and
# the mix @ Wg2 matmul in the finalize step.
# Grid: (node_row_tiles, adj_k_tiles), f32 accumulator, pl.when init/finalize.
# ----------------------------------------------------------------------------
def _gcn_pass1_kernel(adj_ref, s_ref, enc_ref, wg2_ref, bg1_ref, bgd_ref,
                      hdeg_ref, gw2_ref, acc_ref, *, p_mix, p_enc, tk):
    k = pl.program_id(1)

    @pl.when(k == 0)
    def _():
        acc_ref[...] = jnp.zeros_like(acc_ref)

    koff = pl.multiple_of(k * tk, tk)
    acc_ref[...] += jnp.dot(adj_ref[...], s_ref[pl.ds(koff, tk), :],
                            preferred_element_type=jnp.float32)

    @pl.when(k == pl.num_programs(1) - 1)
    def _():
        acc = acc_ref[...]
        h1 = acc[:, :p_enc] + bg1_ref[...]                       # gnn_1
        hdeg_ref[...] = acc[:, p_enc:] + bgd_ref[...]            # pred_node_degree
        mix = (1.0 - p_mix) * h1 + p_mix * enc_ref[...]
        gw2_ref[...] = jnp.dot(mix.astype(wg2_ref.dtype), wg2_ref[...],
                               preferred_element_type=jnp.float32
                               ).astype(gw2_ref.dtype)           # mix @ Wg2


# ----------------------------------------------------------------------------
# Kernel 3: second adj pass (gnn_2 aggregation) + fused log_softmax epilogue.
# ----------------------------------------------------------------------------
def _gcn_pass2_kernel(adj_ref, gw2_ref, bg2_ref, pred_ref, acc_ref, *, tk):
    k = pl.program_id(1)

    @pl.when(k == 0)
    def _():
        acc_ref[...] = jnp.zeros_like(acc_ref)

    koff = pl.multiple_of(k * tk, tk)
    acc_ref[...] += jnp.dot(adj_ref[...], gw2_ref[pl.ds(koff, tk), :],
                            preferred_element_type=jnp.float32)

    @pl.when(k == pl.num_programs(1) - 1)
    def _():
        h2 = acc_ref[...] + bg2_ref[...]   # padded class lanes biased to -1e30
        m = jnp.max(h2, axis=-1, keepdims=True)
        s = h2 - m
        lse = jnp.log(jnp.sum(jnp.exp(s), axis=-1, keepdims=True))
        pred_ref[...] = s - lse


# ----------------------------------------------------------------------------
# Host-side parameter preparation (transpose / lane-pad / concat / cast).
# Call ONCE and cache; not per forward.
# ----------------------------------------------------------------------------
def prepare_params(params, compute_dtype=jnp.bfloat16):
    cd = compute_dtype

    def pad2(w, r, c):
        return jnp.pad(w, ((0, r - w.shape[0]), (0, c - w.shape[1])))

    def pad_b(b, c, fill=0.0):
        return jnp.pad(b, (0, c - b.shape[0]),
                       constant_values=fill).reshape(1, -1).astype(jnp.float32)

    we, be = params["enc_1"]               # (n_enc, n_in)
    wc, bc = params["class_layer"]         # (n_hid, n_enc)
    wd, bd = params["dec_1"]               # (n_dec, n_hid)
    wx, bx = params["x_bar_layer"]         # (n_in,  n_dec)
    wg1, bg1 = params["gnn_1"]             # (n_enc, n_in)
    wg2, bg2 = params["gnn_2"]             # (n_cls, n_enc)
    wgd, bgd = params["pred_node_degree"]  # (1,     n_hid)

    n_enc, n_in = we.shape
    n_hid = wc.shape[0]
    n_dec = wd.shape[0]
    n_cls = wg2.shape[0]

    p_in = _rup(n_in, _LANE)
    p_enc = _rup(n_enc, _LANE)
    p_hid = _rup(n_hid, _LANE)
    p_dec = _rup(n_dec, _LANE)
    p_cls = _rup(n_cls, _LANE)
    p_deg = _LANE

    prepped = dict(
        # shared-operand concatenations (PyTorch (out,in) -> (in,out), padded)
        wxcat=jnp.concatenate([pad2(we.T, p_in, p_enc),
                               pad2(wg1.T, p_in, p_enc)], axis=1).astype(cd),
        wzcat=jnp.concatenate([pad2(wd.T, p_hid, p_dec),
                               pad2(wgd.T, p_hid, p_deg)], axis=1).astype(cd),
        wc=pad2(wc.T, p_enc, p_hid).astype(cd),
        wx=pad2(wx.T, p_dec, p_in).astype(cd),
        wg2=pad2(wg2.T, p_enc, p_cls).astype(cd),
        be=pad_b(be, p_enc),
        bc=pad_b(bc, p_hid),
        bd=pad_b(bd, p_dec),
        bx=pad_b(bx, p_in),
        bg1=pad_b(bg1, p_enc),
        bg2=pad_b(bg2, p_cls, fill=_NEG_INF),
        bgd=pad_b(bgd, p_deg),
    )
    return prepped, n_in, n_cls


def _vmem_limit(block_bytes):
    # double-buffered blocks + 25% headroom + fixed margin, floor 32 MiB
    need = int(2 * block_bytes * 1.25) + (8 << 20)
    return int(min(max(need, 32 << 20), 128 << 20))


# ----------------------------------------------------------------------------
# Jitted forward: pad inputs, 3 gridded pallas_calls, un-pad slices.
# ----------------------------------------------------------------------------
@functools.partial(jax.jit,
                   static_argnames=("p_mix", "n_in", "n_cls", "compute_dtype"))
def _eas_gcn_forward_impl(prepped, x, adj, *, p_mix, n_in, n_cls,
                          compute_dtype):
    cd = compute_dtype
    csz = jnp.dtype(cd).itemsize

    n = x.shape[0]
    p_in = prepped["wxcat"].shape[0]
    p_enc = prepped["be"].shape[1]
    p_hid = prepped["bc"].shape[1]
    p_dec = prepped["bd"].shape[1]
    p_cls = prepped["bg2"].shape[1]
    p_deg = prepped["bgd"].shape[1]
    p_s = p_enc + p_deg

    # --- node / adj tiling (re-derived per problem size; 512-wide adj tiles
    #     once N is big enough, 128 otherwise so the grid always divides) ---
    tile = 512 if n >= 512 else _LANE
    n_pad = _rup(n, tile)
    tm = tk = tile
    n_row_tiles = n_pad // tm
    n_k_tiles = n_pad // tk

    x_p = jnp.zeros((n_pad, p_in), cd).at[:n, :n_in].set(x.astype(cd))
    adj_p = jnp.zeros((n_pad, n_pad), cd).at[:n, :n].set(adj.astype(cd))

    # ================= kernel 1: per-node AE + XW slab =================
    node_bytes = (tm * p_in * csz + p_in * 2 * p_enc * csz
                  + p_enc * p_hid * csz + p_hid * (p_dec + p_deg) * csz
                  + p_dec * p_in * csz
                  + (p_enc + p_hid + p_dec + p_in) * 4
                  + tm * p_in * 4 + tm * p_enc * 4 + tm * p_s * csz)

    x_bar_p, enc_p, s_p = pl.pallas_call(
        functools.partial(_node_kernel, p_enc=p_enc, p_dec=p_dec),
        grid=(n_row_tiles,),
        in_specs=[
            pl.BlockSpec((tm, p_in), lambda i: (i, 0)),          # x rows
            pl.BlockSpec((p_in, 2 * p_enc), lambda i: (0, 0)),   # [We|Wg1]
            pl.BlockSpec((1, p_enc), lambda i: (0, 0)),          # be
            pl.BlockSpec((p_enc, p_hid), lambda i: (0, 0)),      # Wc
            pl.BlockSpec((1, p_hid), lambda i: (0, 0)),          # bc
            pl.BlockSpec((p_hid, p_dec + p_deg), lambda i: (0, 0)),  # [Wd|Wgd]
            pl.BlockSpec((1, p_dec), lambda i: (0, 0)),          # bd
            pl.BlockSpec((p_dec, p_in), lambda i: (0, 0)),       # Wx
            pl.BlockSpec((1, p_in), lambda i: (0, 0)),           # bx
        ],
        out_specs=(
            pl.BlockSpec((tm, p_in), lambda i: (i, 0)),
            pl.BlockSpec((tm, p_enc), lambda i: (i, 0)),
            pl.BlockSpec((tm, p_s), lambda i: (i, 0)),
        ),
        out_shape=(
            jax.ShapeDtypeStruct((n_pad, p_in), jnp.float32),    # x_bar
            jax.ShapeDtypeStruct((n_pad, p_enc), jnp.float32),   # enc_h1
            jax.ShapeDtypeStruct((n_pad, p_s), cd),              # [xWg1|zWgd]
        ),
        compiler_params=pltpu.CompilerParams(
            dimension_semantics=("parallel",),
            vmem_limit_bytes=_vmem_limit(node_bytes)),
    )(x_p, prepped["wxcat"], prepped["be"], prepped["wc"], prepped["bc"],
      prepped["wzcat"], prepped["bd"], prepped["wx"], prepped["bx"])

    # ======== kernel 2: adj pass 1 (gnn_1 + degree head) + mix@Wg2 ========
    gcn1_bytes = (tm * tk * csz + n_pad * p_s * csz + tm * p_enc * 4
                  + p_enc * p_cls * csz + (p_enc + p_deg) * 4
                  + tm * p_deg * 4 + tm * p_cls * csz + tm * p_s * 4)

    hdeg_p, gw2_p = pl.pallas_call(
        functools.partial(_gcn_pass1_kernel, p_mix=p_mix, p_enc=p_enc, tk=tk),
        grid=(n_row_tiles, n_k_tiles),
        in_specs=[
            pl.BlockSpec((tm, tk), lambda i, k: (i, k)),          # adj tile
            pl.BlockSpec((n_pad, p_s), lambda i, k: (0, 0)),      # XW slab (resident)
            pl.BlockSpec((tm, p_enc), lambda i, k: (i, 0)),       # enc_h1 rows
            pl.BlockSpec((p_enc, p_cls), lambda i, k: (0, 0)),    # Wg2
            pl.BlockSpec((1, p_enc), lambda i, k: (0, 0)),        # bg1
            pl.BlockSpec((1, p_deg), lambda i, k: (0, 0)),        # bgd
        ],
        out_specs=(
            pl.BlockSpec((tm, p_deg), lambda i, k: (i, 0)),       # degree head
            pl.BlockSpec((tm, p_cls), lambda i, k: (i, 0)),       # mix @ Wg2
        ),
        out_shape=(
            jax.ShapeDtypeStruct((n_pad, p_deg), jnp.float32),
            jax.ShapeDtypeStruct((n_pad, p_cls), cd),
        ),
        scratch_shapes=[pltpu.VMEM((tm, p_s), jnp.float32)],
        compiler_params=pltpu.CompilerParams(
            dimension_semantics=("parallel", "arbitrary"),
            vmem_limit_bytes=_vmem_limit(gcn1_bytes)),
    )(adj_p, s_p, enc_p, prepped["wg2"], prepped["bg1"], prepped["bgd"])

    # ============ kernel 3: adj pass 2 (gnn_2) + log_softmax ============
    gcn2_bytes = (tm * tk * csz + n_pad * p_cls * csz + p_cls * 4
                  + tm * p_cls * 4 + tm * p_cls * 4)

    pred_p = pl.pallas_call(
        functools.partial(_gcn_pass2_kernel, tk=tk),
        grid=(n_row_tiles, n_k_tiles),
        in_specs=[
            pl.BlockSpec((tm, tk), lambda i, k: (i, k)),          # adj tile
            pl.BlockSpec((n_pad, p_cls), lambda i, k: (0, 0)),    # mix@Wg2 (resident)
            pl.BlockSpec((1, p_cls), lambda i, k: (0, 0)),        # bg2
        ],
        out_specs=pl.BlockSpec((tm, p_cls), lambda i, k: (i, 0)),
        out_shape=jax.ShapeDtypeStruct((n_pad, p_cls), jnp.float32),
        scratch_shapes=[pltpu.VMEM((tm, p_cls), jnp.float32)],
        compiler_params=pltpu.CompilerParams(
            dimension_semantics=("parallel", "arbitrary"),
            vmem_limit_bytes=_vmem_limit(gcn2_bytes)),
    )(adj_p, gw2_p, prepped["bg2"])

    # un-pad (mandatory: padded lanes/rows are garbage-by-convention)
    x_bar = x_bar_p[:n, :n_in]
    predict = pred_p[:n, :n_cls]
    h_pred_nd = hdeg_p[:n, :1]
    return x_bar, predict, h_pred_nd


def eas_gcn_forward(params, x, adj, p_mix=0.5, compute_dtype=jnp.bfloat16):
    # Convenience entry; for repeated calls, prepare_params once and call
    # _eas_gcn_forward_impl directly (prep is hoisted out of the jitted path).
    prepped, n_in, n_cls = prepare_params(params, compute_dtype)
    return _eas_gcn_forward_impl(prepped, x, adj, p_mix=float(p_mix),
                                 n_in=n_in, n_cls=n_cls,
                                 compute_dtype=compute_dtype)


# ----------------------------------------------------------------------------
# Parameter init (PyTorch nn.Linear / PyG GCNConv defaults)
# ----------------------------------------------------------------------------
def init_params(key, n_input, n_enc_1, n_hidden, n_dec_1, n_class):
    def lin_init(k, out_f, in_f):
        kw, kb = jax.random.split(k)
        bound = 1.0 / jnp.sqrt(in_f)
        w = jax.random.uniform(kw, (out_f, in_f), jnp.float32, -bound, bound)
        b = jax.random.uniform(kb, (out_f,), jnp.float32, -bound, bound)
        return w, b

    def gcn_init(k, out_f, in_f):
        bound = jnp.sqrt(6.0 / (in_f + out_f))
        w = jax.random.uniform(k, (out_f, in_f), jnp.float32, -bound, bound)
        b = jnp.zeros((out_f,), jnp.float32)
        return w, b

    keys = jax.random.split(key, 7)
    p = {}
    p["enc_1"] = lin_init(keys[0], n_enc_1, n_input)
    p["class_layer"] = lin_init(keys[1], n_hidden, n_enc_1)
    p["dec_1"] = lin_init(keys[2], n_dec_1, n_hidden)
    p["x_bar_layer"] = lin_init(keys[3], n_input, n_dec_1)
    p["gnn_1"] = gcn_init(keys[4], n_enc_1, n_input)
    p["gnn_2"] = gcn_init(keys[5], n_class, n_enc_1)
    p["pred_node_degree"] = gcn_init(keys[6], 1, n_hidden)
    return p


# ----------------------------------------------------------------------------
# Pure-JAX reference (same cast discipline: bf16 matmul operands, f32 acc).
# ----------------------------------------------------------------------------
def eas_gcn_reference(params, x, adj, p_mix, compute_dtype=jnp.bfloat16):
    cd = compute_dtype

    def lin(a, w, b):
        return jnp.dot(a.astype(cd), w.T.astype(cd),
                       preferred_element_type=jnp.float32) + b

    def gcn(a, w, b):
        xw = jnp.dot(a.astype(cd), w.T.astype(cd),
                     preferred_element_type=jnp.float32)
        return jnp.dot(adj.astype(cd), xw.astype(cd),
                       preferred_element_type=jnp.float32) + b

    we, be = params["enc_1"]
    wc, bc = params["class_layer"]
    wd, bd = params["dec_1"]
    wx, bx = params["x_bar_layer"]
    wg1, bg1 = params["gnn_1"]
    wg2, bg2 = params["gnn_2"]
    wgd, bgd = params["pred_node_degree"]

    enc_h1 = jax.nn.relu(lin(x, we, be))
    z = lin(enc_h1, wc, bc)
    dec_h1 = jax.nn.relu(lin(z, wd, bd))
    x_bar = lin(dec_h1, wx, bx)

    h1 = gcn(x, wg1, bg1)
    h2 = gcn((1.0 - p_mix) * h1 + p_mix * enc_h1, wg2, bg2)
    h_pred_nd = gcn(z, wgd, bgd)
    predict = jax.nn.log_softmax(h2, axis=-1)
    return x_bar, predict, h_pred_nd


# ----------------------------------------------------------------------------
# Main
# ----------------------------------------------------------------------------
if __name__ == "__main__":
    N = 16          # number of graph nodes
    N_INPUT = 32
    N_ENC_1 = 32
    N_HIDDEN = 16
    N_DEC_1 = 32
    N_CLASS = 8
    P_MIX = 0.5

    key = jax.random.PRNGKey(0)
    k_x, k_adj, k_par = jax.random.split(key, 3)

    x = jax.random.normal(k_x, (N, N_INPUT), jnp.float32)

    # Deterministic normalized adjacency: D^-1/2 (A + I) D^-1/2
    a_rand = jax.random.uniform(k_adj, (N, N), jnp.float32)
    a_bin = (a_rand > 0.7).astype(jnp.float32)
    a_sym = jnp.clip(a_bin + a_bin.T, 0.0, 1.0) + jnp.eye(N, dtype=jnp.float32)
    deg = jnp.sum(a_sym, axis=1)
    d_inv_sqrt = 1.0 / jnp.sqrt(deg)
    adj = a_sym * d_inv_sqrt[:, None] * d_inv_sqrt[None, :]

    params = init_params(k_par, N_INPUT, N_ENC_1, N_HIDDEN, N_DEC_1, N_CLASS)

    # prep once (hoisted), forward is a single jit
    prepped, n_in, n_cls = prepare_params(params, jnp.bfloat16)
    x_bar, predict, h_pred_nd = _eas_gcn_forward_impl(
        prepped, x, adj, p_mix=P_MIX, n_in=n_in, n_cls=n_cls,
        compute_dtype=jnp.bfloat16)
    jax.block_until_ready((x_bar, predict, h_pred_nd))

    assert x_bar.shape == (N, N_INPUT)
    assert predict.shape == (N, N_CLASS)
    assert h_pred_nd.shape == (N, 1)
    # log_softmax rows must sum (in prob space) to ~1
    assert bool(jnp.allclose(jnp.sum(jnp.exp(predict), axis=1), 1.0, atol=1e-4))

    # Compare against a pure-JAX reference with matching cast discipline.
    ref = eas_gcn_reference(params, x, adj, P_MIX, compute_dtype=jnp.bfloat16)
    for name, got, want in zip(("x_bar", "predict", "h_pred_nd"),
                               (x_bar, predict, h_pred_nd), ref):
        assert bool(jnp.allclose(got, want, atol=2e-2, rtol=2e-2)), name

    print("KERNEL_OK")
</pallas_src>

<mosaic_0001>
module attributes {stable_mosaic.version = 11 : i64} {
  func.func @_gcn_pass2_kernel(%arg0: i32, %arg1: i32, %arg2: memref<128x128xbf16, #tpu.memory_space<vmem>>, %arg3: memref<128x128xbf16, #tpu.memory_space<vmem>>, %arg4: memref<1x128xf32, #tpu.memory_space<vmem>>, %arg5: memref<128x128xf32, #tpu.memory_space<vmem>>, %arg6: memref<128x128xf32, #tpu.memory_space<vmem>>) attributes {dimension_semantics = [#tpu.dimension_semantics<parallel>, #tpu.dimension_semantics<arbitrary>], iteration_bounds = array<i64: 1, 1>, scalar_prefetch = 0 : i64, scratch_operands = 1 : i64, tpu.core_type = #tpu.core_type<tc>, window_params = [{transform_indices = @transform_0, window_bounds = array<i64: 128, 128>}, {pipeline_mode = #tpu.pipeline_mode<synchronous>, transform_indices = @transform_1, window_bounds = array<i64: 128, 128>}, {pipeline_mode = #tpu.pipeline_mode<synchronous>, transform_indices = @transform_2, window_bounds = array<i64: 1, 128>}, {transform_indices = @transform_3, window_bounds = array<i64: 128, 128>}]} {
    %c0_i32 = arith.constant 0 : i32
    %0 = arith.cmpi eq, %arg1, %c0_i32 : i32
    %1 = arith.extui %0 : i1 to i32
    %c0_i32_0 = arith.constant 0 : i32
    %2 = arith.cmpi ne, %1, %c0_i32_0 : i32
    scf.if %2 {
      %cst_9 = arith.constant 0.000000e+00 : f32
      %15 = vector.broadcast %cst_9 : f32 to vector<128x128xf32>
      %c0_10 = arith.constant 0 : index
      %c0_11 = arith.constant 0 : index
      %16 = vector.load %arg6[%c0_10, %c0_11] : memref<128x128xf32, #tpu.memory_space<vmem>>, vector<128x128xf32>
      tpu.vector_store %arg6[%c0_10, %c0_11], %15 {strides = array<i32>} : memref<128x128xf32, #tpu.memory_space<vmem>>, vector<128x128xf32>,
    } else {
    }
    %c128_i32 = arith.constant 128 : i32
    %3 = arith.muli %arg1, %c128_i32 : i32
    %4 = tpu.assume_multiple %3, 128 : i32
    %c0 = arith.constant 0 : index
    %c0_1 = arith.constant 0 : index
    %5 = vector.load %arg6[%c0, %c0_1] : memref<128x128xf32, #tpu.memory_space<vmem>>, vector<128x128xf32>
    %c0_2 = arith.constant 0 : index
    %c0_3 = arith.constant 0 : index
    %6 = vector.load %arg2[%c0_2, %c0_3] : memref<128x128xbf16, #tpu.memory_space<vmem>>, vector<128x128xbf16>
    %7 = arith.index_cast %4 : i32 to index
    %c0_4 = arith.constant 0 : index
    %8 = vector.load %arg3[%7, %c0_4] : memref<128x128xbf16, #tpu.memory_space<vmem>>, vector<128x128xbf16>
    %cst = arith.constant dense<0.000000e+00> : vector<128x128xf32>
    %9 = tpu.matmul %6, %8, %cst {dimension_numbers = #tpu.dot_dimension_numbers<[1], [0], [0], [1], [0, 0, 1, 1], [], []>} : vector<128x128xbf16>, vector<128x128xbf16>, vector<128x128xf32> -> vector<128x128xf32>
    %10 = arith.addf %5, %9 : vector<128x128xf32>
    %c0_5 = arith.constant 0 : index
    %c0_6 = arith.constant 0 : index
    %11 = vector.load %arg6[%c0_5, %c0_6] : memref<128x128xf32, #tpu.memory_space<vmem>>, vector<128x128xf32>
    tpu.vector_store %arg6[%c0_5, %c0_6], %10 {strides = array<i32>} : memref<128x128xf32, #tpu.memory_space<vmem>>, vector<128x128xf32>,
    %c0_i32_7 = arith.constant 0 : i32
    %12 = arith.cmpi eq, %arg1, %c0_i32_7 : i32
    %13 = arith.extui %12 : i1 to i32
    %c0_i32_8 = arith.constant 0 : i32
    %14 = arith.cmpi ne, %13, %c0_i32_8 : i32
    scf.if %14 {
      %c0_9 = arith.constant 0 : index
      %c0_10 = arith.constant 0 : index
      %15 = vector.load %arg6[%c0_9, %c0_10] : memref<128x128xf32, #tpu.memory_space<vmem>>, vector<128x128xf32>
      %c0_11 = arith.constant 0 : index
      %c0_12 = arith.constant 0 : index
      %16 = vector.load %arg4[%c0_11, %c0_12] : memref<1x128xf32, #tpu.memory_space<vmem>>, vector<1x128xf32>
      %17 = vector.broadcast %16 : vector<1x128xf32> to vector<128x128xf32>
      %18 = arith.addf %15, %17 : vector<128x128xf32>
      %cst_13 = arith.constant dense<0xFF800000> : vector<128xf32>
      %19 = vector.multi_reduction <maximumf>, %18, %cst_13 [1] : vector<128x128xf32> to vector<128xf32>
      %20 = vector.shape_cast %19 : vector<128xf32> to vector<128x1xf32>
      %21 = vector.broadcast %20 : vector<128x1xf32> to vector<128x128xf32>
      %22 = arith.subf %18, %21 : vector<128x128xf32>
      %23 = math.exp %22 : vector<128x128xf32>
      %cst_14 = arith.constant dense<0.000000e+00> : vector<128xf32>
      %24 = vector.multi_reduction <add>, %23, %cst_14 [1] : vector<128x128xf32> to vector<128xf32>
      %25 = vector.shape_cast %24 : vector<128xf32> to vector<128x1xf32>
      %26 = math.log %25 : vector<128x1xf32>
      %27 = vector.broadcast %26 : vector<128x1xf32> to vector<128x128xf32>
      %28 = arith.subf %22, %27 : vector<128x128xf32>
      %c0_15 = arith.constant 0 : index
      %c0_16 = arith.constant 0 : index
      %29 = vector.load %arg5[%c0_15, %c0_16] : memref<128x128xf32, #tpu.memory_space<vmem>>, vector<128x128xf32>
      tpu.vector_store %arg5[%c0_15, %c0_16], %28 {strides = array<i32>} : memref<128x128xf32, #tpu.memory_space<vmem>>, vector<128x128xf32>,
    } else {
    }
    return
  }
  func.func @transform_0(%arg0: i32, %arg1: i32) -> (i32, i32) {
    %c0_i32 = arith.constant 0 : i32
    return %arg0, %arg1 : i32, i32
  }
  func.func @transform_1(%arg0: i32, %arg1: i32) -> (i32, i32) {
    %c0_i32 = arith.constant 0 : i32
    %c0_i32_0 = arith.constant 0 : i32
    %c0_i32_1 = arith.constant 0 : i32
    return %c0_i32, %c0_i32_0 : i32, i32
  }
  func.func @transform_2(%arg0: i32, %arg1: i32) -> (i32, i32) {
    %c0_i32 = arith.constant 0 : i32
    %c0_i32_0 = arith.constant 0 : i32
    %c0_i32_1 = arith.constant 0 : i32
    return %c0_i32, %c0_i32_0 : i32, i32
  }
  func.func @transform_3(%arg0: i32, %arg1: i32) -> (i32, i32) {
    %c0_i32 = arith.constant 0 : i32
    %c0_i32_0 = arith.constant 0 : i32
    return %arg0, %c0_i32 : i32, i32
  }
}

module attributes {stable_mosaic.version = 11 : i64} {
  func.func @_node_kernel(%arg0: i32, %arg1: memref<128x128xbf16, #tpu.memory_space<vmem>>, %arg2: memref<128x256xbf16, #tpu.memory_space<vmem>>, %arg3: memref<1x128xf32, #tpu.memory_space<vmem>>, %arg4: memref<128x128xbf16, #tpu.memory_space<vmem>>, %arg5: memref<1x128xf32, #tpu.memory_space<vmem>>, %arg6: memref<128x256xbf16, #tpu.memory_space<vmem>>, %arg7: memref<1x128xf32, #tpu.memory_space<vmem>>, %arg8: memref<128x128xbf16, #tpu.memory_space<vmem>>, %arg9: memref<1x128xf32, #tpu.memory_space<vmem>>, %arg10: memref<128x128xf32, #tpu.memory_space<vmem>>, %arg11: memref<128x128xf32, #tpu.memory_space<vmem>>, %arg12: memref<128x256xbf16, #tpu.memory_space<vmem>>) attributes {dimension_semantics = [#tpu.dimension_semantics<parallel>], iteration_bounds = array<i64: 1>, scalar_prefetch = 0 : i64, scratch_operands = 0 : i64, tpu.core_type = #tpu.core_type<tc>, window_params = [{transform_indices = @transform_0, window_bounds = array<i64: 128, 128>}, {pipeline_mode = #tpu.pipeline_mode<synchronous>, transform_indices = @transform_1, window_bounds = array<i64: 128, 256>}, {pipeline_mode = #tpu.pipeline_mode<synchronous>, transform_indices = @transform_2, window_bounds = array<i64: 1, 128>}, {pipeline_mode = #tpu.pipeline_mode<synchronous>, transform_indices = @transform_3, window_bounds = array<i64: 128, 128>}, {pipeline_mode = #tpu.pipeline_mode<synchronous>, transform_indices = @transform_4, window_bounds = array<i64: 1, 128>}, {pipeline_mode = #tpu.pipeline_mode<synchronous>, transform_indices = @transform_5, window_bounds = array<i64: 128, 256>}, {pipeline_mode = #tpu.pipeline_mode<synchronous>, transform_indices = @transform_6, window_bounds = array<i64: 1, 128>}, {pipeline_mode = #tpu.pipeline_mode<synchronous>, transform_indices = @transform_7, window_bounds = array<i64: 128, 128>}, {pipeline_mode = #tpu.pipeline_mode<synchronous>, transform_indices = @transform_8, window_bounds = array<i64: 1, 128>}, {transform_indices = @transform_9, window_bounds = array<i64: 128, 128>}, {transform_indices = @transform_10, window_bounds = array<i64: 128, 128>}, {transform_indices = @transform_11, window_bounds = array<i64: 128, 256>}]} {
    %c0 = arith.constant 0 : index
    %c0_0 = arith.constant 0 : index
    %0 = vector.load %arg1[%c0, %c0_0] : memref<128x128xbf16, #tpu.memory_space<vmem>>, vector<128x128xbf16>
    %c0_1 = arith.constant 0 : index
    %c0_2 = arith.constant 0 : index
    %1 = vector.load %arg2[%c0_1, %c0_2] : memref<128x256xbf16, #tpu.memory_space<vmem>>, vector<128x256xbf16>
    %cst = arith.constant dense<0.000000e+00> : vector<128x256xf32>
    %2 = tpu.matmul %0, %1, %cst {dimension_numbers = #tpu.dot_dimension_numbers<[1], [0], [0], [1], [0, 0, 1, 1], [], []>} : vector<128x128xbf16>, vector<128x256xbf16>, vector<128x256xf32> -> vector<128x256xf32>
    %3 = vector.extract_strided_slice %2 {offsets = [0, 0], sizes = [128, 128], strides = [1, 1]} : vector<128x256xf32> to vector<128x128xf32>
    %c0_3 = arith.constant 0 : index
    %c0_4 = arith.constant 0 : index
    %4 = vector.load %arg3[%c0_3, %c0_4] : memref<1x128xf32, #tpu.memory_space<vmem>>, vector<1x128xf32>
    %5 = vector.broadcast %4 : vector<1x128xf32> to vector<128x128xf32>
    %6 = arith.addf %3, %5 : vector<128x128xf32>
    %cst_5 = arith.constant 0.000000e+00 : f32
    %7 = vector.broadcast %cst_5 : f32 to vector<128x128xf32>
    %8 = arith.maximumf %6, %7 : vector<128x128xf32>
    %c0_6 = arith.constant 0 : index
    %c0_7 = arith.constant 0 : index
    %9 = vector.load %arg4[%c0_6, %c0_7] : memref<128x128xbf16, #tpu.memory_space<vmem>>, vector<128x128xbf16>
    %10 = arith.truncf %8 : vector<128x128xf32> to vector<128x128xbf16>
    %cst_8 = arith.constant dense<0.000000e+00> : vector<128x128xf32>
    %11 = tpu.matmul %10, %9, %cst_8 {dimension_numbers = #tpu.dot_dimension_numbers<[1], [0], [0], [1], [0, 0, 1, 1], [], []>} : vector<128x128xbf16>, vector<128x128xbf16>, vector<128x128xf32> -> vector<128x128xf32>
    %c0_9 = arith.constant 0 : index
    %c0_10 = arith.constant 0 : index
    %12 = vector.load %arg5[%c0_9, %c0_10] : memref<1x128xf32, #tpu.memory_space<vmem>>, vector<1x128xf32>
    %13 = vector.broadcast %12 : vector<1x128xf32> to vector<128x128xf32>
    %14 = arith.addf %11, %13 : vector<128x128xf32>
    %c0_11 = arith.constant 0 : index
    %c0_12 = arith.constant 0 : index
    %15 = vector.load %arg6[%c0_11, %c0_12] : memref<128x256xbf16, #tpu.memory_space<vmem>>, vector<128x256xbf16>
    %16 = arith.truncf %14 : vector<128x128xf32> to vector<128x128xbf16>
    %cst_13 = arith.constant dense<0.000000e+00> : vector<128x256xf32>
    %17 = tpu.matmul %16, %15, %cst_13 {dimension_numbers = #tpu.dot_dimension_numbers<[1], [0], [0], [1], [0, 0, 1, 1], [], []>} : vector<128x128xbf16>, vector<128x256xbf16>, vector<128x256xf32> -> vector<128x256xf32>
    %18 = vector.extract_strided_slice %17 {offsets = [0, 0], sizes = [128, 128], strides = [1, 1]} : vector<128x256xf32> to vector<128x128xf32>
    %c0_14 = arith.constant 0 : index
    %c0_15 = arith.constant 0 : index
    %19 = vector.load %arg7[%c0_14, %c0_15] : memref<1x128xf32, #tpu.memory_space<vmem>>, vector<1x128xf32>
    %20 = vector.broadcast %19 : vector<1x128xf32> to vector<128x128xf32>
    %21 = arith.addf %18, %20 : vector<128x128xf32>
    %cst_16 = arith.constant 0.000000e+00 : f32
    %22 = vector.broadcast %cst_16 : f32 to vector<128x128xf32>
    %23 = arith.maximumf %21, %22 : vector<128x128xf32>
    %c0_17 = arith.constant 0 : index
    %c0_18 = arith.constant 0 : index
    %24 = vector.load %arg8[%c0_17, %c0_18] : memref<128x128xbf16, #tpu.memory_space<vmem>>, vector<128x128xbf16>
    %25 = arith.truncf %23 : vector<128x128xf32> to vector<128x128xbf16>
    %cst_19 = arith.constant dense<0.000000e+00> : vector<128x128xf32>
    %26 = tpu.matmul %25, %24, %cst_19 {dimension_numbers = #tpu.dot_dimension_numbers<[1], [0], [0], [1], [0, 0, 1, 1], [], []>} : vector<128x128xbf16>, vector<128x128xbf16>, vector<128x128xf32> -> vector<128x128xf32>
    %c0_20 = arith.constant 0 : index
    %c0_21 = arith.constant 0 : index
    %27 = vector.load %arg9[%c0_20, %c0_21] : memref<1x128xf32, #tpu.memory_space<vmem>>, vector<1x128xf32>
    %28 = vector.broadcast %27 : vector<1x128xf32> to vector<128x128xf32>
    %29 = arith.addf %26, %28 : vector<128x128xf32>
    %c0_22 = arith.constant 0 : index
    %c0_23 = arith.constant 0 : index
    %30 = vector.load %arg10[%c0_22, %c0_23] : memref<128x128xf32, #tpu.memory_space<vmem>>, vector<128x128xf32>
    tpu.vector_store %arg10[%c0_22, %c0_23], %29 {strides = array<i32>} : memref<128x128xf32, #tpu.memory_space<vmem>>, vector<128x128xf32>,
    %c0_24 = arith.constant 0 : index
    %c0_25 = arith.constant 0 : index
    %31 = vector.load %arg11[%c0_24, %c0_25] : memref<128x128xf32, #tpu.memory_space<vmem>>, vector<128x128xf32>
    tpu.vector_store %arg11[%c0_24, %c0_25], %8 {strides = array<i32>} : memref<128x128xf32, #tpu.memory_space<vmem>>, vector<128x128xf32>,
    %32 = vector.extract_strided_slice %2 {offsets = [0, 128], sizes = [128, 128], strides = [1, 1]} : vector<128x256xf32> to vector<128x128xf32>
    %33 = arith.truncf %32 : vector<128x128xf32> to vector<128x128xbf16>
    %c0_26 = arith.constant 0 : index
    %c0_27 = arith.constant 0 : index
    %34 = vector.load %arg12[%c0_26, %c0_27] : memref<128x256xbf16, #tpu.memory_space<vmem>>, vector<128x128xbf16>
    tpu.vector_store %arg12[%c0_26, %c0_27], %33 {strides = array<i32>} : memref<128x256xbf16, #tpu.memory_space<vmem>>, vector<128x128xbf16>,
    %35 = vector.extract_strided_slice %17 {offsets = [0, 128], sizes = [128, 128], strides = [1, 1]} : vector<128x256xf32> to vector<128x128xf32>
    %36 = arith.truncf %35 : vector<128x128xf32> to vector<128x128xbf16>
    %c0_28 = arith.constant 0 : index
    %c128 = arith.constant 128 : index
    %37 = vector.load %arg12[%c0_28, %c128] : memref<128x256xbf16, #tpu.memory_space<vmem>>, vector<128x128xbf16>
    tpu.vector_store %arg12[%c0_28, %c128], %36 {strides = array<i32>} : memref<128x256xbf16, #tpu.memory_space<vmem>>, vector<128x128xbf16>,
    return
  }
  func.func @transform_0(%arg0: i32) -> (i32, i32) {
    %c0_i32 = arith.constant 0 : i32
    %c0_i32_0 = arith.constant 0 : i32
    return %arg0, %c0_i32 : i32, i32
  }
  func.func @transform_1(%arg0: i32) -> (i32, i32) {
    %c0_i32 = arith.constant 0 : i32
    %c0_i32_0 = arith.constant 0 : i32
    %c0_i32_1 = arith.constant 0 : i32
    return %c0_i32, %c0_i32_0 : i32, i32
  }
  func.func @transform_2(%arg0: i32) -> (i32, i32) {
    %c0_i32 = arith.constant 0 : i32
    %c0_i32_0 = arith.constant 0 : i32
    %c0_i32_1 = arith.constant 0 : i32
    return %c0_i32, %c0_i32_0 : i32, i32
  }
  func.func @transform_3(%arg0: i32) -> (i32, i32) {
    %c0_i32 = arith.constant 0 : i32
    %c0_i32_0 = arith.constant 0 : i32
    %c0_i32_1 = arith.constant 0 : i32
    return %c0_i32, %c0_i32_0 : i32, i32
  }
  func.func @transform_4(%arg0: i32) -> (i32, i32) {
    %c0_i32 = arith.constant 0 : i32
    %c0_i32_0 = arith.constant 0 : i32
    %c0_i32_1 = arith.constant 0 : i32
    return %c0_i32, %c0_i32_0 : i32, i32
  }
  func.func @transform_5(%arg0: i32) -> (i32, i32) {
    %c0_i32 = arith.constant 0 : i32
    %c0_i32_0 = arith.constant 0 : i32
    %c0_i32_1 = arith.constant 0 : i32
    return %c0_i32, %c0_i32_0 : i32, i32
  }
  func.func @transform_6(%arg0: i32) -> (i32, i32) {
    %c0_i32 = arith.constant 0 : i32
    %c0_i32_0 = arith.constant 0 : i32
    %c0_i32_1 = arith.constant 0 : i32
    return %c0_i32, %c0_i32_0 : i32, i32
  }
  func.func @transform_7(%arg0: i32) -> (i32, i32) {
    %c0_i32 = arith.constant 0 : i32
    %c0_i32_0 = arith.constant 0 : i32
    %c0_i32_1 = arith.constant 0 : i32
    return %c0_i32, %c0_i32_0 : i32, i32
  }
  func.func @transform_8(%arg0: i32) -> (i32, i32) {
    %c0_i32 = arith.constant 0 : i32
    %c0_i32_0 = arith.constant 0 : i32
    %c0_i32_1 = arith.constant 0 : i32
    return %c0_i32, %c0_i32_0 : i32, i32
  }
  func.func @transform_9(%arg0: i32) -> (i32, i32) {
    %c0_i32 = arith.constant 0 : i32
    %c0_i32_0 = arith.constant 0 : i32
    return %arg0, %c0_i32 : i32, i32
  }
  func.func @transform_10(%arg0: i32) -> (i32, i32) {
    %c0_i32 = arith.constant 0 : i32
    %c0_i32_0 = arith.constant 0 : i32
    return %arg0, %c0_i32 : i32, i32
  }
  func.func @transform_11(%arg0: i32) -> (i32, i32) {
    %c0_i32 = arith.constant 0 : i32
    %c0_i32_0 = arith.constant 0 : i32
    return %arg0, %c0_i32 : i32, i32
  }
}

module attributes {stable_mosaic.version = 11 : i64} {
  func.func @_gcn_pass1_kernel(%arg0: i32, %arg1: i32, %arg2: memref<128x128xbf16, #tpu.memory_space<vmem>>, %arg3: memref<128x256xbf16, #tpu.memory_space<vmem>>, %arg4: memref<128x128xf32, #tpu.memory_space<vmem>>, %arg5: memref<128x128xbf16, #tpu.memory_space<vmem>>, %arg6: memref<1x128xf32, #tpu.memory_space<vmem>>, %arg7: memref<1x128xf32, #tpu.memory_space<vmem>>, %arg8: memref<128x128xf32, #tpu.memory_space<vmem>>, %arg9: memref<128x128xbf16, #tpu.memory_space<vmem>>, %arg10: memref<128x256xf32, #tpu.memory_space<vmem>>) attributes {dimension_semantics = [#tpu.dimension_semantics<parallel>, #tpu.dimension_semantics<arbitrary>], iteration_bounds = array<i64: 1, 1>, scalar_prefetch = 0 : i64, scratch_operands = 1 : i64, tpu.core_type = #tpu.core_type<tc>, window_params = [{transform_indices = @transform_0, window_bounds = array<i64: 128, 128>}, {pipeline_mode = #tpu.pipeline_mode<synchronous>, transform_indices = @transform_1, window_bounds = array<i64: 128, 256>}, {transform_indices = @transform_2, window_bounds = array<i64: 128, 128>}, {pipeline_mode = #tpu.pipeline_mode<synchronous>, transform_indices = @transform_3, window_bounds = array<i64: 128, 128>}, {pipeline_mode = #tpu.pipeline_mode<synchronous>, transform_indices = @transform_4, window_bounds = array<i64: 1, 128>}, {pipeline_mode = #tpu.pipeline_mode<synchronous>, transform_indices = @transform_5, window_bounds = array<i64: 1, 128>}, {transform_indices = @transform_6, window_bounds = array<i64: 128, 128>}, {transform_indices = @transform_7, window_bounds = array<i64: 128, 128>}]} {
    %c0_i32 = arith.constant 0 : i32
    %0 = arith.cmpi eq, %arg1, %c0_i32 : i32
    %1 = arith.extui %0 : i1 to i32
    %c0_i32_0 = arith.constant 0 : i32
    %2 = arith.cmpi ne, %1, %c0_i32_0 : i32
    scf.if %2 {
      %cst_9 = arith.constant 0.000000e+00 : f32
      %15 = vector.broadcast %cst_9 : f32 to vector<128x256xf32>
      %c0_10 = arith.constant 0 : index
      %c0_11 = arith.constant 0 : index
      %16 = vector.load %arg10[%c0_10, %c0_11] : memref<128x256xf32, #tpu.memory_space<vmem>>, vector<128x256xf32>
      tpu.vector_store %arg10[%c0_10, %c0_11], %15 {strides = array<i32>} : memref<128x256xf32, #tpu.memory_space<vmem>>, vector<128x256xf32>,
    } else {
    }
    %c128_i32 = arith.constant 128 : i32
    %3 = arith.muli %arg1, %c128_i32 : i32
    %4 = tpu.assume_multiple %3, 128 : i32
    %c0 = arith.constant 0 : index
    %c0_1 = arith.constant 0 : index
    %5 = vector.load %arg10[%c0, %c0_1] : memref<128x256xf32, #tpu.memory_space<vmem>>, vector<128x256xf32>
    %c0_2 = arith.constant 0 : index
    %c0_3 = arith.constant 0 : index
    %6 = vector.load %arg2[%c0_2, %c0_3] : memref<128x128xbf16, #tpu.memory_space<vmem>>, vector<128x128xbf16>
    %7 = arith.index_cast %4 : i32 to index
    %c0_4 = arith.constant 0 : index
    %8 = vector.load %arg3[%7, %c0_4] : memref<128x256xbf16, #tpu.memory_space<vmem>>, vector<128x256xbf16>
    %cst = arith.constant dense<0.000000e+00> : vector<128x256xf32>
    %9 = tpu.matmul %6, %8, %cst {dimension_numbers = #tpu.dot_dimension_numbers<[1], [0], [0], [1], [0, 0, 1, 1], [], []>} : vector<128x128xbf16>, vector<128x256xbf16>, vector<128x256xf32> -> vector<128x256xf32>
    %10 = arith.addf %5, %9 : vector<128x256xf32>
    %c0_5 = arith.constant 0 : index
    %c0_6 = arith.constant 0 : index
    %11 = vector.load %arg10[%c0_5, %c0_6] : memref<128x256xf32, #tpu.memory_space<vmem>>, vector<128x256xf32>
    tpu.vector_store %arg10[%c0_5, %c0_6], %10 {strides = array<i32>} : memref<128x256xf32, #tpu.memory_space<vmem>>, vector<128x256xf32>,
    %c0_i32_7 = arith.constant 0 : i32
    %12 = arith.cmpi eq, %arg1, %c0_i32_7 : i32
    %13 = arith.extui %12 : i1 to i32
    %c0_i32_8 = arith.constant 0 : i32
    %14 = arith.cmpi ne, %13, %c0_i32_8 : i32
    scf.if %14 {
      %c0_9 = arith.constant 0 : index
      %c0_10 = arith.constant 0 : index
      %15 = vector.load %arg10[%c0_9, %c0_10] : memref<128x256xf32, #tpu.memory_space<vmem>>, vector<128x256xf32>
      %16 = vector.extract_strided_slice %15 {offsets = [0, 0], sizes = [128, 128], strides = [1, 1]} : vector<128x256xf32> to vector<128x128xf32>
      %c0_11 = arith.constant 0 : index
      %c0_12 = arith.constant 0 : index
      %17 = vector.load %arg6[%c0_11, %c0_12] : memref<1x128xf32, #tpu.memory_space<vmem>>, vector<1x128xf32>
      %18 = vector.broadcast %17 : vector<1x128xf32> to vector<128x128xf32>
      %19 = arith.addf %16, %18 : vector<128x128xf32>
      %20 = vector.extract_strided_slice %15 {offsets = [0, 128], sizes = [128, 128], strides = [1, 1]} : vector<128x256xf32> to vector<128x128xf32>
      %c0_13 = arith.constant 0 : index
      %c0_14 = arith.constant 0 : index
      %21 = vector.load %arg7[%c0_13, %c0_14] : memref<1x128xf32, #tpu.memory_space<vmem>>, vector<1x128xf32>
      %22 = vector.broadcast %21 : vector<1x128xf32> to vector<128x128xf32>
      %23 = arith.addf %20, %22 : vector<128x128xf32>
      %c0_15 = arith.constant 0 : index
      %c0_16 = arith.constant 0 : index
      %24 = vector.load %arg8[%c0_15, %c0_16] : memref<128x128xf32, #tpu.memory_space<vmem>>, vector<128x128xf32>
      tpu.vector_store %arg8[%c0_15, %c0_16], %23 {strides = array<i32>} : memref<128x128xf32, #tpu.memory_space<vmem>>, vector<128x128xf32>,
      %cst_17 = arith.constant 5.000000e-01 : f32
      %25 = vector.broadcast %cst_17 : f32 to vector<128x128xf32>
      %26 = arith.mulf %25, %19 : vector<128x128xf32>
      %c0_18 = arith.constant 0 : index
      %c0_19 = arith.constant 0 : index
      %27 = vector.load %arg4[%c0_18, %c0_19] : memref<128x128xf32, #tpu.memory_space<vmem>>, vector<128x128xf32>
      %cst_20 = arith.constant 5.000000e-01 : f32
      %28 = vector.broadcast %cst_20 : f32 to vector<128x128xf32>
      %29 = arith.mulf %28, %27 : vector<128x128xf32>
      %30 = arith.addf %26, %29 : vector<128x128xf32>
      %31 = arith.truncf %30 : vector<128x128xf32> to vector<128x128xbf16>
      %c0_21 = arith.constant 0 : index
      %c0_22 = arith.constant 0 : index
      %32 = vector.load %arg5[%c0_21, %c0_22] : memref<128x128xbf16, #tpu.memory_space<vmem>>, vector<128x128xbf16>
      %cst_23 = arith.constant dense<0.000000e+00> : vector<128x128xf32>
      %33 = tpu.matmul %31, %32, %cst_23 {dimension_numbers = #tpu.dot_dimension_numbers<[1], [0], [0], [1], [0, 0, 1, 1], [], []>} : vector<128x128xbf16>, vector<128x128xbf16>, vector<128x128xf32> -> vector<128x128xf32>
      %34 = arith.truncf %33 : vector<128x128xf32> to vector<128x128xbf16>
      %c0_24 = arith.constant 0 : index
      %c0_25 = arith.constant 0 : index
      %35 = vector.load %arg9[%c0_24, %c0_25] : memref<128x128xbf16, #tpu.memory_space<vmem>>, vector<128x128xbf16>
      tpu.vector_store %arg9[%c0_24, %c0_25], %34 {strides = array<i32>} : memref<128x128xbf16, #tpu.memory_space<vmem>>, vector<128x128xbf16>,
    } else {
    }
    return
  }
  func.func @transform_0(%arg0: i32, %arg1: i32) -> (i32, i32) {
    %c0_i32 = arith.constant 0 : i32
    return %arg0, %arg1 : i32, i32
  }
  func.func @transform_1(%arg0: i32, %arg1: i32) -> (i32, i32) {
    %c0_i32 = arith.constant 0 : i32
    %c0_i32_0 = arith.constant 0 : i32
    %c0_i32_1 = arith.constant 0 : i32
    return %c0_i32, %c0_i32_0 : i32, i32
  }
  func.func @transform_2(%arg0: i32, %arg1: i32) -> (i32, i32) {
    %c0_i32 = arith.constant 0 : i32
    %c0_i32_0 = arith.constant 0 : i32
    return %arg0, %c0_i32 : i32, i32
  }
  func.func @transform_3(%arg0: i32, %arg1: i32) -> (i32, i32) {
    %c0_i32 = arith.constant 0 : i32
    %c0_i32_0 = arith.constant 0 : i32
    %c0_i32_1 = arith.constant 0 : i32
    return %c0_i32, %c0_i32_0 : i32, i32
  }
  func.func @transform_4(%arg0: i32, %arg1: i32) -> (i32, i32) {
    %c0_i32 = arith.constant 0 : i32
    %c0_i32_0 = arith.constant 0 : i32
    %c0_i32_1 = arith.constant 0 : i32
    return %c0_i32, %c0_i32_0 : i32, i32
  }
  func.func @transform_5(%arg0: i32, %arg1: i32) -> (i32, i32) {
    %c0_i32 = arith.constant 0 : i32
    %c0_i32_0 = arith.constant 0 : i32
    %c0_i32_1 = arith.constant 0 : i32
    return %c0_i32, %c0_i32_0 : i32, i32
  }
  func.func @transform_6(%arg0: i32, %arg1: i32) -> (i32, i32) {
    %c0_i32 = arith.constant 0 : i32
    %c0_i32_0 = arith.constant 0 : i32
    return %arg0, %c0_i32 : i32, i32
  }
  func.func @transform_7(%arg0: i32, %arg1: i32) -> (i32, i32) {
    %c0_i32 = arith.constant 0 : i32
    %c0_i32_0 = arith.constant 0 : i32
    return %arg0, %c0_i32 : i32, i32
  }
}

</mosaic_0001>

<bundles_post_ra>
// kernel: _eas_gcn_forward_impl.5
= control target key start
LH: loop header
LB: loop body
LE: loop exit
PB: predicated region body
PF: predicated region fallthrough
CT: control target
= control target key end

     0   :  { %s865_s1 = inlined_call_operand.vmem [shape: bf16[128,128], index: 1, kind: input, shape index: {}]   ;;  %s866_s2 = inlined_call_operand.vmem [shape: f32[1,128], index: 2, kind: input, shape index: {}]   ;;  %s867_s0 = inlined_call_operand.vmem [shape: bf16[128,128], index: 0, kind: input, shape index: {}]   ;;  %s868_s3 = inlined_call_operand.vmem [shape: f32[128,128], index: 3, kind: output, shape index: {}]  }
   0x1   :  { %v564_v0 = vld [vmem:[%s865_s1 + $0x38] sm:$0xff]  ;;  %v563_v1 = vld [vmem:[%s865_s1 + $0x30] sm:$0xff]  ;;  %v562_v2 = vld [vmem:[%s865_s1 + $0x28] sm:$0xff] }
   0x2   :  { %183 = vmatpush.bf16.msra.mxu0 %v564_v0  ;;  %565 = vmatpush.bf16.msra.mxu1 %v564_v0  ;;  %v561_v3 = vld [vmem:[%s865_s1 + $0x20] sm:$0xff]  ;;  %v560_v4 = vld [vmem:[%s865_s1 + $0x18] sm:$0xff]  ;;  %v559_v5 = vld [vmem:[%s865_s1 + $0x10] sm:$0xff] }
   0x3   :  { %566 = vmatpush.bf16.msra.mxu2 %v564_v0  ;;  %567 = vmatpush.bf16.msra.mxu3 %v564_v0  ;;  %v558_v6 = vld [vmem:[%s865_s1 + $0x8] sm:$0xff]  ;;  %v557_v7 = vld [vmem:[%s865_s1] sm:$0xff]  ;;  %v551_v9 = vld [vmem:[%s867_s0 + $0x10] sm:$0xff] }
   0x4   :  { %v549_v8 = vld [vmem:[%s867_s0] sm:$0xff]  ;;  %v555_v11 = vld [vmem:[%s867_s0 + $0x30] sm:$0xff]  ;;  %v550_v12 = vld [vmem:[%s867_s0 + $0x8] sm:$0xff] }
   0x5   :  { %v553_v10 = vld [vmem:[%s867_s0 + $0x20] sm:$0xff]  ;;  %v552_v13 = vld [vmem:[%s867_s0 + $0x18] sm:$0xff]  ;;  %v554_v14 = vld [vmem:[%s867_s0 + $0x28] sm:$0xff] }
   0x6   :  { %184 = vmatpush.bf16.msra.mxu0 %v563_v1  ;;  %568 = vmatpush.bf16.msra.mxu1 %v563_v1  ;;  %v556_v15 = vld [vmem:[%s867_s0 + $0x38] sm:$0xff]  ;;  %v589_v16 = vld [vmem:[%s866_s2] ss:$0 sm:$0xff] }
   0x7   :  { %569 = vmatpush.bf16.msra.mxu2 %v563_v1  ;;  %570 = vmatpush.bf16.msra.mxu3 %v563_v1 }
   0xa   :  { %185 = vmatpush.bf16.msra.mxu0 %v562_v2  ;;  %571 = vmatpush.bf16.msra.mxu1 %v562_v2 }
   0xb   :  { %572 = vmatpush.bf16.msra.mxu2 %v562_v2  ;;  %573 = vmatpush.bf16.msra.mxu3 %v562_v2 }
   0xe   :  { %186 = vmatpush.bf16.msra.mxu0 %v561_v3  ;;  %574 = vmatpush.bf16.msra.mxu1 %v561_v3 }
   0xf   :  { %575 = vmatpush.bf16.msra.mxu2 %v561_v3  ;;  %576 = vmatpush.bf16.msra.mxu3 %v561_v3 }
  0x12   :  { %187 = vmatpush.bf16.msra.mxu0 %v560_v4  ;;  %577 = vmatpush.bf16.msra.mxu1 %v560_v4 }
  0x13   :  { %578 = vmatpush.bf16.msra.mxu2 %v560_v4  ;;  %579 = vmatpush.bf16.msra.mxu3 %v560_v4 }
  0x16   :  { %188 = vmatpush.bf16.msra.mxu0 %v559_v5  ;;  %580 = vmatpush.bf16.msra.mxu1 %v559_v5 }
  0x17   :  { %581 = vmatpush.bf16.msra.mxu2 %v559_v5  ;;  %582 = vmatpush.bf16.msra.mxu3 %v559_v5 }
  0x1a   :  { %189 = vmatpush.bf16.msra.mxu0 %v558_v6  ;;  %583 = vmatpush.bf16.msra.mxu1 %v558_v6 }
  0x1b   :  { %584 = vmatpush.bf16.msra.mxu2 %v558_v6  ;;  %585 = vmatpush.bf16.msra.mxu3 %v558_v6 }
  0x1e   :  { %190 = vmatpush.bf16.msra.mxu0 %v557_v7  ;;  %586 = vmatpush.bf16.msra.mxu1 %v557_v7 }
  0x1f   :  { %587 = vmatpush.bf16.msra.mxu2 %v557_v7  ;;  %588 = vmatpush.bf16.msra.mxu3 %v557_v7 }
  0x21   :  { %191 = vmatmul.bf16.vlgmr.msra.gmra.mxu0 %v549_v8  ;;  %201 = vmatmul.bf16.vlgmr.msra.gmra.mxu1 %v551_v9 }
  0x22   :  { %211 = vmatmul.bf16.vlgmr.msra.gmra.mxu2 %v553_v10  ;;  %221 = vmatmul.bf16.vlgmr.msra.gmra.mxu3 %v555_v11 }
  0x31   :  { %196 = vmatmul.bf16.gmra.mxu0 %v550_v12  ;;  %206 = vmatmul.bf16.gmra.mxu1 %v552_v13 }
  0x32   :  { %216 = vmatmul.bf16.gmra.mxu2 %v554_v14  ;;  %226 = vmatmul.bf16.gmra.mxu3 %v556_v15 }
  0x9e   :  { %v192_v17 = vpop.f32.mrf.mxu0  ;;  %v202_v18 = vpop.f32.mrf.mxu1 }
  0x9f   :  { %v287_v19 = vadd.f32 %v589_v16, %v192_v17  ;;  %v291_v20 = vadd.f32 %v589_v16, %v202_v18 }
  0xa1   :  { %311 = vmax.xlane.f32.xlu2 %v291_v20  ;;  %303 = vmax.xlane.f32.xlu0 %v287_v19 }
  0xa5   :  { %v212_v21 = vpop.f32.mrf.mxu2  ;;  %v222_v22 = vpop.f32.mrf.mxu3 }
  0xa6   :  { %v295_v23 = vadd.f32 %v589_v16, %v212_v21  ;;  %v299_v24 = vadd.f32 %v589_v16, %v222_v22  ;;  %v194_v25 = vpop.f32.mrf.mxu0  ;;  %v204_v26 = vpop.f32.mrf.mxu1 }
  0xa7   :  { %v288_v29 = vadd.f32 %v589_v16, %v194_v25  ;;  %v292_v30 = vadd.f32 %v589_v16, %v204_v26 }
  0xa9   :  { %319 = vmax.xlane.f32.xlu2 %v295_v23  ;;  %327 = vmax.xlane.f32.xlu0 %v299_v24 }
  0xad   :  { %v214_v27 = vpop.f32.mrf.mxu2  ;;  %v224_v32 = vpop.f32.mrf.mxu3 }
  0xae   :  { %v197_v28 = vpop.f32.mrf.mxu0  ;;  %v296_v35 = vadd.f32 %v589_v16, %v214_v27  ;;  %v207_v37 = vpop.f32.mrf.mxu1  ;;  %v743_v48 = vadd.f32 %v589_v16, %v224_v32 }
  0xaf   :  { %v289_v31 = vadd.f32 %v589_v16, %v197_v28  ;;  %v725_v39 = vadd.f32 %v589_v16, %v207_v37 }
  0xb1   :  { %313 = vmax.xlane.f32.xlu2 %v292_v30  ;;  %305 = vmax.xlane.f32.xlu0 %v288_v29 }
  0xb2   :  { %307 = vmax.xlane.f32.xlu1 %v289_v31 }
  0xb5   :  { %v217_v33 = vpop.f32.mrf.mxu2  ;;  %v227_v36 = vpop.f32.mrf.mxu3 }
  0xb6   :  { %v297_v34 = vadd.f32 %v589_v16, %v217_v33  ;;  %v199_v38 = vpop.f32.mrf.mxu0  ;;  %v734_v44 = vadd.f32 %v589_v16, %v227_v36  ;;  %v209_v45 = vpop.f32.mrf.mxu1 }
  0xb7   :  { %v729_v42 = vadd.f32 %v589_v16, %v199_v38  ;;  %v738_v47 = vadd.f32 %v589_v16, %v209_v45 }
  0xb9   :  { %321 = vmax.xlane.f32.xlu0 %v296_v35 }
  0xba   :  { %323 = vmax.xlane.f32.xlu1 %v297_v34 }
  0xbd   :  { %v219_v40 = vpop.f32.mrf.mxu2  ;;  %v229_v43 = vpop.f32.mrf.mxu3 }
  0xbe   :  { %v727_v41 = vadd.f32 %v589_v16, %v219_v40  ;;  %v736_v46 = vadd.f32 %v589_v16, %v229_v43 }
  0xc0   :  { %325 = vmax.xlane.f32.xlu2 %v727_v41 }
  0xc1   :  { %315 = vmax.xlane.f32.xlu0 %v725_v39 }
  0xc2   :  { %309 = vmax.xlane.f32.xlu1 %v729_v42 }
  0xc8   :  { %331 = vmax.xlane.f32.xlu2 %v734_v44 }
  0xc9   :  { %333 = vmax.xlane.f32.xlu0 %v736_v46 }
  0xca   :  { %317 = vmax.xlane.f32.xlu1 %v738_v47 }
  0xd2   :  { %329 = vmax.xlane.f32.xlu1 %v743_v48 }
 0x114   :  { %v312_v49 = vpop.xlane.xlu2 %311  ;;  %v304_v50 = vpop.xlane.xlu0 %303 }
 0x115   :  { %v746_v51 = vsub.f32 %v291_v20, %v312_v49  ;;  %v748_v52 = vsub.f32 %v287_v19, %v304_v50 }
 0x117   :  { %v359_v53 = vmul.f32 1.442695, %v746_v51  ;;  %v351_v54 = vmul.f32 1.442695, %v748_v52 }
 0x119   :  { %590 = vpow2.f32 %v359_v53 }
 0x11a   :  { %592 = vpow2.f32 %v351_v54 }
 0x11c   :  { %v320_v55 = vpop.xlane.xlu2 %319  ;;  %v328_v56 = vpop.xlane.xlu0 %327 }
 0x11d   :  { %v752_v57 = vsub.f32 %v295_v23, %v320_v55  ;;  %v754_v58 = vsub.f32 %v299_v24, %v328_v56 }
 0x11f   :  { %v591_v59 = vpop.eup %590  ;;  %v367_v60 = vmul.f32 1.442695, %v752_v57  ;;  %v375_v61 = vmul.f32 1.442695, %v754_v58 }
 0x120   :  { %v593_v62 = vpop.eup %592  ;;  %391 = vadd.xlane.f32.xlu2 %v591_v59 }
 0x121   :  { %594 = vpow2.f32 %v367_v60  ;;  %383 = vadd.xlane.f32.xlu1 %v593_v62 }
 0x122   :  { %596 = vpow2.f32 %v375_v61 }
 0x124   :  { %v314_v63 = vpop.xlane.xlu2 %313  ;;  %v306_v0 = vpop.xlane.xlu0 %305 }
 0x125   :  { %v758_v1 = vsub.f32 %v292_v30, %v314_v63  ;;  %v760_v2 = vsub.f32 %v288_v29, %v306_v0  ;;  %v308_v3 = vpop.xlane.xlu1 %307 }
 0x126   :  { %v764_v8 = vsub.f32 %v289_v31, %v308_v3 }
 0x127   :  { %v595_v4 = vpop.eup %594  ;;  %v361_v5 = vmul.f32 1.442695, %v758_v1  ;;  %v353_v6 = vmul.f32 1.442695, %v760_v2 }
 0x128   :  { %v597_v7 = vpop.eup %596  ;;  %399 = vadd.xlane.f32.xlu0 %v595_v4  ;;  %v355_v9 = vmul.f32 1.442695, %v764_v8 }
 0x129   :  { %598 = vpow2.f32 %v361_v5  ;;  %407 = vadd.xlane.f32.xlu1 %v597_v7 }
 0x12a   :  { %600 = vpow2.f32 %v353_v6 }
 0x12b   :  { %602 = vpow2.f32 %v355_v9 }
 0x12c   :  { %v322_v10 = vpop.xlane.xlu0 %321 }
 0x12d   :  { %v767_v11 = vsub.f32 %v296_v35, %v322_v10  ;;  %v324_v12 = vpop.xlane.xlu1 %323 }
 0x12e   :  { %v769_v13 = vsub.f32 %v297_v34, %v324_v12 }
 0x12f   :  { %v599_v14 = vpop.eup %598  ;;  %v369_v15 = vmul.f32 1.442695, %v767_v11 }
 0x130   :  { %v601_v16 = vpop.eup %600  ;;  %v371_v17 = vmul.f32 1.442695, %v769_v13  ;;  %393 = vadd.xlane.f32.xlu0 %v599_v14 }
 0x131   :  { %604 = vpow2.f32 %v369_v15  ;;  %385 = vadd.xlane.f32.xlu2 %v601_v16  ;;  %v603_v23 = vpop.eup %602 }
 0x132   :  { %606 = vpow2.f32 %v371_v17 }
 0x133   :  { %v326_v18 = vpop.xlane.xlu2 %325 }
 0x134   :  { %v774_v19 = vsub.f32 %v727_v41, %v326_v18  ;;  %v316_v20 = vpop.xlane.xlu0 %315 }
 0x135   :  { %v777_v21 = vsub.f32 %v725_v39, %v316_v20  ;;  %v310_v22 = vpop.xlane.xlu1 %309 }
 0x136   :  { %v373_v24 = vmul.f32 1.442695, %v774_v19  ;;  %v782_v28 = vsub.f32 %v729_v42, %v310_v22 }
 0x137   :  { %v605_v25 = vpop.eup %604  ;;  %v363_v26 = vmul.f32 1.442695, %v777_v21 }
 0x138   :  { %v607_v27 = vpop.eup %606  ;;  %608 = vpow2.f32 %v373_v24  ;;  %387 = vadd.xlane.f32.xlu0 %v603_v23  ;;  %401 = vadd.xlane.f32.xlu1 %v605_v25  ;;  %v357_v30 = vmul.f32 1.442695, %v782_v28 }
 0x139   :  { %610 = vpow2.f32 %v363_v26  ;;  %403 = vadd.xlane.f32.xlu2 %v607_v27 }
 0x13a   :  { %612 = vpow2.f32 %v357_v30 }
 0x13b   :  { %v332_v29 = vpop.xlane.xlu2 %331 }
 0x13c   :  { %v786_v31 = vsub.f32 %v734_v44, %v332_v29  ;;  %v334_v35 = vpop.xlane.xlu0 %333 }
 0x13d   :  { %v318_v32 = vpop.xlane.xlu1 %317  ;;  %v794_v39 = vsub.f32 %v736_v46, %v334_v35 }
 0x13e   :  { %v609_v33 = vpop.eup %608  ;;  %v379_v34 = vmul.f32 1.442695, %v786_v31  ;;  %v790_v36 = vsub.f32 %v738_v47, %v318_v32 }
 0x13f   :  { %v611_v37 = vpop.eup %610  ;;  %v381_v40 = vmul.f32 1.442695, %v794_v39 }
 0x140   :  { %v365_v38 = vmul.f32 1.442695, %v790_v36  ;;  %405 = vadd.xlane.f32.xlu0 %v609_v33  ;;  %395 = vadd.xlane.f32.xlu1 %v611_v37  ;;  %614 = vpow2.f32 %v379_v34  ;;  %v613_v42 = vpop.eup %612 }
 0x142   :  { %616 = vpow2.f32 %v365_v38 }
 0x143   :  { %618 = vpow2.f32 %v381_v40 }
 0x145   :  { %v330_v41 = vpop.xlane.xlu1 %329 }
 0x146   :  { %v798_v43 = vsub.f32 %v743_v48, %v330_v41  ;;  %v615_v44 = vpop.eup %614 }
 0x148   :  { %v617_v45 = vpop.eup %616  ;;  %v377_v47 = vmul.f32 1.442695, %v798_v43  ;;  %411 = vadd.xlane.f32.xlu0 %v615_v44  ;;  %389 = vadd.xlane.f32.xlu1 %v613_v42 }
 0x149   :  { %397 = vadd.xlane.f32.xlu2 %v617_v45  ;;  %v619_v49 = vpop.eup %618 }
 0x14a   :  { %620 = vpow2.f32 %v377_v47 }
 0x150   :  { %v621_v46 = vpop.eup %620  ;;  %413 = vadd.xlane.f32.xlu1 %v619_v49 }
 0x151   :  { %409 = vadd.xlane.f32.xlu2 %v621_v46 }
 0x193   :  { %v392_v50 = vpop.xlane.xlu2 %391 }
 0x194   :  { %622 = vlog2.f32 %v392_v50  ;;  %v384_v53 = vpop.xlane.xlu1 %383 }
 0x195   :  { %624 = vlog2.f32 %v384_v53 }
 0x19a   :  { %v623_v54 = vpop.eup %622 }
 0x19b   :  { %v625_v48 = vpop.eup %624  ;;  %v424_v55 = vmul.f32 0.6931472, %v623_v54  ;;  %v400_v56 = vpop.xlane.xlu0 %399 }
 0x19c   :  { %v416_v59 = vmul.f32 0.6931472, %v625_v48  ;;  %626 = vlog2.f32 %v400_v56  ;;  %v408_v60 = vpop.xlane.xlu1 %407 }
 0x19d   :  { %v451_v61 = vsub.f32 %v746_v51, %v424_v55  ;;  %628 = vlog2.f32 %v408_v60 }
 0x19e   :  { %v447_v62 = vsub.f32 %v748_v52, %v416_v59 }
 0x19f   :  { %467 = vst [vmem:[%s868_s3 + $0x20] sm:$0xff] %v451_v61 }
 0x1a0   :  { %463 = vst [vmem:[%s868_s3] sm:$0xff] %v447_v62 }
 0x1a2   :  { %v627_v63 = vpop.eup %626 }
 0x1a3   :  { %v629_v0 = vpop.eup %628  ;;  %v432_v3 = vmul.f32 0.6931472, %v627_v63  ;;  %v394_v4 = vpop.xlane.xlu0 %393 }
 0x1a4   :  { %v440_v5 = vmul.f32 0.6931472, %v629_v0  ;;  %v386_v6 = vpop.xlane.xlu2 %385  ;;  %630 = vlog2.f32 %v394_v4 }
 0x1a5   :  { %v455_v51 = vsub.f32 %v752_v57, %v432_v3  ;;  %632 = vlog2.f32 %v386_v6 }
 0x1a6   :  { %v459_v52 = vsub.f32 %v754_v58, %v440_v5 }
 0x1a7   :  { %471 = vst [vmem:[%s868_s3 + $0x40] sm:$0xff] %v455_v51 }
 0x1a8   :  { %475 = vst [vmem:[%s868_s3 + $0x60] sm:$0xff] %v459_v52 }
 0x1aa   :  { %v631_v7 = vpop.eup %630 }
 0x1ab   :  { %v633_v9 = vpop.eup %632  ;;  %v426_v10 = vmul.f32 0.6931472, %v631_v7  ;;  %v388_v12 = vpop.xlane.xlu0 %387 }
 0x1ac   :  { %v402_v14 = vpop.xlane.xlu1 %401  ;;  %v418_v15 = vmul.f32 0.6931472, %v633_v9  ;;  %634 = vlog2.f32 %v388_v12  ;;  %v404_v16 = vpop.xlane.xlu2 %403 }
 0x1ad   :  { %v452_v57 = vsub.f32 %v758_v1, %v426_v10  ;;  %636 = vlog2.f32 %v404_v16 }
 0x1ae   :  { %v448_v58 = vsub.f32 %v760_v2, %v418_v15  ;;  %638 = vlog2.f32 %v402_v14 }
 0x1af   :  { %468 = vst [vmem:[%s868_s3 + $0x28] sm:$0xff] %v452_v57 }
 0x1b0   :  { %464 = vst [vmem:[%s868_s3 + $0x8] sm:$0xff] %v448_v58 }
 0x1b2   :  { %v635_v17 = vpop.eup %634 }
 0x1b3   :  { %v637_v18 = vpop.eup %636  ;;  %v420_v20 = vmul.f32 0.6931472, %v635_v17  ;;  %v406_v22 = vpop.xlane.xlu0 %405 }
 0x1b4   :  { %v396_v23 = vpop.xlane.xlu1 %395  ;;  %v639_v24 = vpop.eup %638  ;;  %v436_v25 = vmul.f32 0.6931472, %v637_v18  ;;  %640 = vlog2.f32 %v406_v22 }
 0x1b5   :  { %v449_v1 = vsub.f32 %v764_v8, %v420_v20  ;;  %v434_v2 = vmul.f32 0.6931472, %v639_v24  ;;  %642 = vlog2.f32 %v396_v23 }
 0x1b6   :  { %v457_v26 = vsub.f32 %v769_v13, %v436_v25 }
 0x1b7   :  { %465 = vst [vmem:[%s868_s3 + $0x10] sm:$0xff] %v449_v1  ;;  %v456_v27 = vsub.f32 %v767_v11, %v434_v2 }
 0x1b8   :  { %473 = vst [vmem:[%s868_s3 + $0x50] sm:$0xff] %v457_v26 }
 0x1b9   :  { %472 = vst [vmem:[%s868_s3 + $0x48] sm:$0xff] %v456_v27 }
 0x1ba   :  { %v641_v29 = vpop.eup %640 }
 0x1bb   :  { %v643_v8 = vpop.eup %642  ;;  %v438_v30 = vmul.f32 0.6931472, %v641_v29  ;;  %v412_v32 = vpop.xlane.xlu0 %411 }
 0x1bc   :  { %v390_v33 = vpop.xlane.xlu1 %389  ;;  %v428_v13 = vmul.f32 0.6931472, %v643_v8  ;;  %644 = vlog2.f32 %v412_v32  ;;  %v398_v34 = vpop.xlane.xlu2 %397 }
 0x1bd   :  { %v458_v35 = vsub.f32 %v774_v19, %v438_v30  ;;  %646 = vlog2.f32 %v398_v34 }
 0x1be   :  { %v453_v11 = vsub.f32 %v777_v21, %v428_v13  ;;  %648 = vlog2.f32 %v390_v33 }
 0x1bf   :  { %474 = vst [vmem:[%s868_s3 + $0x58] sm:$0xff] %v458_v35 }
 0x1c0   :  { %469 = vst [vmem:[%s868_s3 + $0x30] sm:$0xff] %v453_v11 }
 0x1c2   :  { %v645_v37 = vpop.eup %644 }
 0x1c3   :  { %v647_v38 = vpop.eup %646  ;;  %v444_v40 = vmul.f32 0.6931472, %v645_v37 }
 0x1c4   :  { %v414_v41 = vpop.xlane.xlu1 %413  ;;  %v649_v42 = vpop.eup %648  ;;  %v430_v44 = vmul.f32 0.6931472, %v647_v38 }
 0x1c5   :  { %v410_v45 = vpop.xlane.xlu2 %409  ;;  %650 = vlog2.f32 %v414_v41  ;;  %v461_v19 = vsub.f32 %v786_v31, %v444_v40  ;;  %v422_v21 = vmul.f32 0.6931472, %v649_v42 }
 0x1c6   :  { %652 = vlog2.f32 %v410_v45  ;;  %v454_v47 = vsub.f32 %v790_v36, %v430_v44 }
 0x1c7   :  { %477 = vst [vmem:[%s868_s3 + $0x70] sm:$0xff] %v461_v19  ;;  %v450_v49 = vsub.f32 %v782_v28, %v422_v21 }
 0x1c8   :  { %470 = vst [vmem:[%s868_s3 + $0x38] sm:$0xff] %v454_v47 }
 0x1c9   :  { %466 = vst [vmem:[%s868_s3 + $0x18] sm:$0xff] %v450_v49 }
 0x1cb   :  { %v651_v46 = vpop.eup %650 }
 0x1cc   :  { %v653_v31 = vpop.eup %652  ;;  %v446_v50 = vmul.f32 0.6931472, %v651_v46 }
 0x1cd   :  { %v442_v53 = vmul.f32 0.6931472, %v653_v31 }
 0x1ce   :  { %v462_v36 = vsub.f32 %v794_v39, %v446_v50 }
 0x1cf   :  { %v460_v54 = vsub.f32 %v798_v43, %v442_v53 }
 0x1d0   :  { %478 = vst [vmem:[%s868_s3 + $0x78] sm:$0xff] %v462_v36 }
 0x1d1   :  { %476 = vst [vmem:[%s868_s3 + $0x68] sm:$0xff] %v460_v54 }

// kernel: _eas_gcn_forward_impl.3
= control target key start
LH: loop header
LB: loop body
LE: loop exit
PB: predicated region body
PF: predicated region fallthrough
CT: control target
= control target key end

     0   :  { %17 = vsyncpa [#allocation3], 0  ;;  %s1884_s0 = inlined_call_operand.vmem [shape: bf16[128,128], index: 0, kind: input, shape index: {}]   ;;  %s1885_s1 = inlined_call_operand.vmem [shape: bf16[128,256], index: 1, kind: input, shape index: {}]   ;;  %s1886_s2 = inlined_call_operand.vmem [shape: f32[1,128], index: 2, kind: input, shape index: {}]   ;;  %s1887_s3 = inlined_call_operand.hbm [shape: bf16[128,128], index: 3, kind: input, shape index: {}]   ;;  %s1888_s4 = inlined_call_operand.vmem [shape: f32[1,128], index: 4, kind: input, shape index: {}]   ;;  %s1889_s5 = inlined_call_operand.hbm [shape: bf16[128,256], index: 5, kind: input, shape index: {}]   ;;  %s1890_s6 = inlined_call_operand.vmem [shape: f32[1,128], index: 6, kind: input, shape index: {}]   ;;  %s1891_s7 = inlined_call_operand.hbm [shape: bf16[128,128], index: 7, kind: input, shape index: {}]   ;;  %s1892_s8 = inlined_call_operand.vmem [shape: f32[1,128], index: 8, kind: input, shape index: {}]   ;;  %s1893_s9 = inlined_call_operand.vmem [shape: f32[128,128], index: 9, kind: output, shape index: {0}]   ;;  %s1894_s10 = inlined_call_operand.vmem [shape: f32[128,128], index: 10, kind: output, shape index: {1}]   ;;  %s1895_s11 = inlined_call_operand.vmem [shape: bf16[128,256], index: 11, kind: output, shape index: {2}]  }
   0x1   :  { %18 = vsyncpa [#allocation5], 0  ;;  %s44_s19 = sshll.u32 %s1889_s5, 4  ;;  %s1357_s20 = smov [#allocation4]   ;;  %s45_s19 = int_to_ptr.hbm [resolvable:$true] %s44_s19 }
   0x2   :  { %s46_s21 = sshll.u32 %s1357_s20, 4  ;;  %s29_s24 = sshll.u32 %s1887_s3, 4  ;;  %s47_s21 = int_to_ptr.vmem [resolvable:$true] %s46_s21  ;;  %s30_s24 = int_to_ptr.hbm [resolvable:$true] %s29_s24 }
   0x3   :  { %s1358_s25 = smov 128   ;;  %s1359_s26 = smov 8  }
   0x4   :  { %52 = dma.hbm_to_vmem [thread:$0]  %s45_s19, 2048, %s47_s21, [#allocation5], %s1358_s25, %s1358_s25, %s1359_s26  }
   0x5   :  { %s1360_s27 = smov [#allocation2]   ;;  %s1361_s29 = smov 64  }
   0x6   :  { %s31_s28 = sshll.u32 %s1360_s27, 4  ;;  %s1362_s30 = smov 4   ;;  %s32_s28 = int_to_ptr.vmem [resolvable:$true] %s31_s28 }
   0x7   :  { %37 = dma.hbm_to_vmem [thread:$0]  %s30_s24, 1024, %s32_s28, [#allocation3], %s1361_s29, %s1361_s29, %s1362_s30  }
   0x8   :  { %s59_s13 = sshll.u32 %s1891_s7, 4  ;;  %s1363_s14 = smov [#allocation6]   ;;  %s60_s13 = int_to_ptr.hbm [resolvable:$true] %s59_s13 }
   0x9   :  { %s61_s15 = sshll.u32 %s1363_s14, 4  ;;  %s62_s15 = int_to_ptr.vmem [resolvable:$true] %s61_s15 }
   0xa   :  { %67 = dma.hbm_to_vmem [thread:$0]  %s60_s13, 1024, %s62_s15, [#allocation5], %s1361_s29, %s1361_s29, %s1362_s30  }
   0xb   :  { %1353 = dma.done.wait [#allocation3], 1024  }
   0xc   :  { %1354 = vsyncadd [#allocation3], 4294966272 }
   0xd   :  { %1355 = dma.done.wait [#allocation5], 3072  }
   0xe   :  { %1356 = vsyncadd [#allocation5], 4294964224  ;;  %v1064_v0 = vld [vmem:[%s1885_s1 + $0x70] sm:$0xf]  ;;  %v1221_v1 = vld [vmem:[%s1885_s1 + $0x74] sm:$0xf0] }
   0xf   :  { %v1056_v2 = vld [vmem:[%s1885_s1 + $0x60] sm:$0xf]  ;;  %v1065_v3 = vor.u32 %v1221_v1, %v1064_v0  ;;  %v1219_v4 = vld [vmem:[%s1885_s1 + $0x64] sm:$0xf0]  ;;  %v1048_v6 = vld [vmem:[%s1885_s1 + $0x50] sm:$0xf] }
  0x10   :  { %v1057_v5 = vor.u32 %v1219_v4, %v1056_v2  ;;  %v1217_v7 = vld [vmem:[%s1885_s1 + $0x54] sm:$0xf0]  ;;  %v1040_v9 = vld [vmem:[%s1885_s1 + $0x40] sm:$0xf]  ;;  %v1215_v10 = vld [vmem:[%s1885_s1 + $0x44] sm:$0xf0] }
  0x11   :  { %242 = vmatpush.bf16.msra.mxu0 %v1065_v3  ;;  %1254 = vmatpush.bf16.msra.mxu2 %v1065_v3  ;;  %v1049_v8 = vor.u32 %v1217_v7, %v1048_v6  ;;  %v1041_v11 = vor.u32 %v1215_v10, %v1040_v9  ;;  %v1032_v12 = vld [vmem:[%s1885_s1 + $0x30] sm:$0xf]  ;;  %v1213_v13 = vld [vmem:[%s1885_s1 + $0x34] sm:$0xf0]  ;;  %v1024_v15 = vld [vmem:[%s1885_s1 + $0x20] sm:$0xf] }
  0x12   :  { %v1033_v14 = vor.u32 %v1213_v13, %v1032_v12  ;;  %v1211_v16 = vld [vmem:[%s1885_s1 + $0x24] sm:$0xf0]  ;;  %v1016_v18 = vld [vmem:[%s1885_s1 + $0x10] sm:$0xf]  ;;  %v1209_v19 = vld [vmem:[%s1885_s1 + $0x14] sm:$0xf0] }
  0x13   :  { %v1025_v17 = vor.u32 %v1211_v16, %v1024_v15  ;;  %v1017_v20 = vor.u32 %v1209_v19, %v1016_v18  ;;  %v1008_v21 = vld [vmem:[%s1885_s1] sm:$0xf]  ;;  %v1207_v22 = vld [vmem:[%s1885_s1 + $0x4] sm:$0xf0]  ;;  %v1229_v27 = vld [vmem:[#allocation2 + $0x38] sm:$0xff] }
  0x14   :  { %v1009_v23 = vor.u32 %v1207_v22, %v1008_v21  ;;  %v1484_v24 = vld [vmem:[%s1884_s0] sm:$0xff]  ;;  %v1490_v25 = vld [vmem:[%s1884_s0 + $0x8] sm:$0xff]  ;;  %v1228_v28 = vld [vmem:[#allocation2 + $0x30] sm:$0xff] }
  0x15   :  { %243 = vmatpush.bf16.msra.mxu0 %v1057_v5  ;;  %1255 = vmatpush.bf16.msra.mxu2 %v1057_v5  ;;  %v1496_v26 = vld [vmem:[%s1884_s0 + $0x20] sm:$0xff]  ;;  %v1227_v29 = vld [vmem:[#allocation2 + $0x28] sm:$0xff]  ;;  %v1502_v30 = vld [vmem:[%s1884_s0 + $0x10] sm:$0xff] }
  0x16   :  { %v1507_v31 = vld [vmem:[%s1884_s0 + $0x28] sm:$0xff]  ;;  %v1226_v32 = vld [vmem:[#allocation2 + $0x20] sm:$0xff]  ;;  %v1225_v33 = vld [vmem:[#allocation2 + $0x18] sm:$0xff] }
  0x17   :  { %v1224_v34 = vld [vmem:[#allocation2 + $0x10] sm:$0xff]  ;;  %v1514_v35 = vld [vmem:[%s1884_s0 + $0x18] sm:$0xff]  ;;  %v1223_v36 = vld [vmem:[#allocation2 + $0x8] sm:$0xff] }
  0x18   :  { %v1519_v37 = vld [vmem:[%s1884_s0 + $0x30] sm:$0xff]  ;;  %v1526_v38 = vld [vmem:[%s1884_s0 + $0x38] sm:$0xff]  ;;  %v1222_v39 = vld [vmem:[#allocation2] sm:$0xff] }
  0x19   :  { %244 = vmatpush.bf16.msra.mxu0 %v1049_v8  ;;  %1256 = vmatpush.bf16.msra.mxu2 %v1049_v8  ;;  %v1532_v40 = vld [vmem:[%s1886_s2] ss:$0 sm:$0xff]  ;;  %v1220_v51 = vld [vmem:[%s1885_s1 + $0x74] sm:$0xf]  ;;  %v1066_v52 = vld [vmem:[%s1885_s1 + $0x78] sm:$0xf0] }
  0x1a   :  { %v1069_v53 = vor.u32 %v1220_v51, %v1066_v52  ;;  %v1218_v57 = vld [vmem:[%s1885_s1 + $0x64] sm:$0xf]  ;;  %v1058_v58 = vld [vmem:[%s1885_s1 + $0x68] sm:$0xf0]  ;;  %v1216_v63 = vld [vmem:[%s1885_s1 + $0x54] sm:$0xf] }
  0x1b   :  { %v1061_v59 = vor.u32 %v1218_v57, %v1058_v58  ;;  %v1050_v0 = vld [vmem:[%s1885_s1 + $0x58] sm:$0xf0]  ;;  %v1214_v3 = vld [vmem:[%s1885_s1 + $0x44] sm:$0xf]  ;;  %v1042_v4 = vld [vmem:[%s1885_s1 + $0x48] sm:$0xf0] }
  0x1c   :  { %1262 = vmatpush.bf16.msra.mxu3 %v1069_v53  ;;  %291 = vmatpush.bf16.msra.mxu1 %v1069_v53  ;;  %v1053_v1 = vor.u32 %v1216_v63, %v1050_v0  ;;  %v1045_v7 = vor.u32 %v1214_v3, %v1042_v4  ;;  %v1212_v10 = vld [vmem:[%s1885_s1 + $0x34] sm:$0xf]  ;;  %v1210_v15 = vld [vmem:[%s1885_s1 + $0x24] sm:$0xf]  ;;  %v1026_v16 = vld [vmem:[%s1885_s1 + $0x28] sm:$0xf0] }
  0x1d   :  { %245 = vmatpush.bf16.msra.mxu0 %v1041_v11  ;;  %1257 = vmatpush.bf16.msra.mxu2 %v1041_v11  ;;  %v1034_v11 = vld [vmem:[%s1885_s1 + $0x38] sm:$0xf0]  ;;  %v1029_v19 = vor.u32 %v1210_v15, %v1026_v16  ;;  %v1152_v53 = vld [vmem:[#allocation4 + $0x60] sm:$0xf]  ;;  %v1235_v16 = vld [vmem:[#allocation4 + $0x24] sm:$0xf0] }
  0x1e   :  { %v1120_v15 = vld [vmem:[#allocation4 + $0x20] sm:$0xf] }
  0x20   :  { %1263 = vmatpush.bf16.msra.mxu3 %v1061_v59  ;;  %292 = vmatpush.bf16.msra.mxu1 %v1061_v59 }
  0x21   :  { %246 = vmatpush.bf16.msra.mxu0 %v1033_v14  ;;  %1258 = vmatpush.bf16.msra.mxu2 %v1033_v14  ;;  %v1037_v14 = vor.u32 %v1212_v10, %v1034_v11  ;;  %v1128_v10 = vld [vmem:[#allocation4 + $0x30] sm:$0xf]  ;;  %v1237_v11 = vld [vmem:[#allocation4 + $0x34] sm:$0xf0] }
  0x24   :  { %1264 = vmatpush.bf16.msra.mxu3 %v1053_v1  ;;  %293 = vmatpush.bf16.msra.mxu1 %v1053_v1  ;;  %v1136_v1 = vld [vmem:[#allocation4 + $0x40] sm:$0xf] }
  0x25   :  { %247 = vmatpush.bf16.msra.mxu0 %v1025_v17  ;;  %1259 = vmatpush.bf16.msra.mxu2 %v1025_v17 }
  0x28   :  { %1265 = vmatpush.bf16.msra.mxu3 %v1045_v7  ;;  %294 = vmatpush.bf16.msra.mxu1 %v1045_v7 }
  0x29   :  { %248 = vmatpush.bf16.msra.mxu0 %v1017_v20  ;;  %1260 = vmatpush.bf16.msra.mxu2 %v1017_v20 }
  0x2c   :  { %1266 = vmatpush.bf16.msra.mxu3 %v1037_v14  ;;  %295 = vmatpush.bf16.msra.mxu1 %v1037_v14  ;;  %v1154_v14 = vld [vmem:[#allocation4 + $0x68] sm:$0xf0] }
  0x2d   :  { %249 = vmatpush.bf16.msra.mxu0 %v1009_v23  ;;  %1261 = vmatpush.bf16.msra.mxu2 %v1009_v23 }
  0x30   :  { %250 = vmatmul.bf16.vlgmr.msra.gmra.mxu0 %v1484_v24  ;;  %270 = vmatmul.bf16.vlgmr.msra.gmra.mxu2 %v1496_v26 }
  0x31   :  { %452 = vmatpush.bf16.msrb.mxu2 %v1229_v27  ;;  %1267 = vmatpush.bf16.msra.mxu3 %v1029_v19 }
  0x32   :  { %296 = vmatpush.bf16.msra.mxu1 %v1029_v19  ;;  %v1112_v19 = vld [vmem:[#allocation4 + $0x10] sm:$0xf] }
  0x35   :  { %453 = vmatpush.bf16.msrb.mxu2 %v1228_v28  ;;  %v1208_v28 = vld [vmem:[%s1885_s1 + $0x14] sm:$0xf] }
  0x39   :  { %454 = vmatpush.bf16.msrb.mxu2 %v1227_v29  ;;  %v1018_v29 = vld [vmem:[%s1885_s1 + $0x18] sm:$0xf0] }
  0x3d   :  { %455 = vmatpush.bf16.msrb.mxu2 %v1226_v32  ;;  %v1021_v32 = vor.u32 %v1208_v28, %v1018_v29  ;;  %v1236_v29 = vld [vmem:[#allocation4 + $0x34] sm:$0xf] }
  0x3f   :  { %1268 = vmatpush.bf16.msra.mxu3 %v1021_v32  ;;  %297 = vmatpush.bf16.msra.mxu1 %v1021_v32  ;;  %v1130_v32 = vld [vmem:[#allocation4 + $0x38] sm:$0xf0] }
  0x40   :  { %255 = vmatmul.bf16.gmra.mxu0 %v1490_v25  ;;  %275 = vmatmul.bf16.gmra.mxu2 %v1507_v31 }
  0x41   :  { %456 = vmatpush.bf16.msrb.mxu2 %v1225_v33  ;;  %v1206_v33 = vld [vmem:[%s1885_s1 + $0x4] sm:$0xf] }
  0x45   :  { %457 = vmatpush.bf16.msrb.mxu2 %v1224_v34  ;;  %v1010_v34 = vld [vmem:[%s1885_s1 + $0x8] sm:$0xf0] }
  0x49   :  { %458 = vmatpush.bf16.msrb.mxu2 %v1223_v36 }
  0x4d   :  { %459 = vmatpush.bf16.msrb.mxu2 %v1222_v39 }
  0x50   :  { %260 = vmatmul.bf16.gmra.mxu0 %v1502_v30  ;;  %280 = vmatmul.bf16.gmra.mxu2 %v1519_v37 }
  0x60   :  { %265 = vmatmul.bf16.gmra.mxu0 %v1514_v35  ;;  %285 = vmatmul.bf16.gmra.mxu2 %v1526_v38 }
  0xad   :  { %v251_v41 = vpop.f32.mrf.mxu0 }
  0xae   :  { %v344_v42 = vadd.f32 %v1532_v40, %v251_v41  ;;  %v1013_v41 = vor.u32 %v1206_v33, %v1010_v34  ;;  %v1133_v33 = vor.u32 %v1236_v29, %v1130_v32 }
  0xb0   :  { %v360_v43 = vmax.f32 %v344_v42, 0.0  ;;  %1269 = vmatpush.bf16.msra.mxu3 %v1013_v41  ;;  %298 = vmatpush.bf16.msra.mxu1 %v1013_v41 }
  0xb2   :  { %880 = vst [vmem:[%s1894_s10] sm:$0xff] %v360_v43 }
  0xb3   :  { %v271_v55 = vpop.f32.mrf.mxu2  ;;  %319 = vmatmul.bf16.vlgmr.msra.gmra.mxu3 %v1496_v26  ;;  %299 = vmatmul.bf16.vlgmr.msra.gmra.mxu1 %v1484_v24  ;;  %v1160_v24 = vld [vmem:[#allocation4 + $0x70] sm:$0xf]  ;;  %v1245_v26 = vld [vmem:[#allocation4 + $0x74] sm:$0xf0] }
  0xb4   :  { %v1563_v62 = vadd.f32 %v1532_v40, %v271_v55 }
  0xb5   :  { %v253_v44 = vpop.f32.mrf.mxu0 }
  0xb6   :  { %v345_v45 = vadd.f32 %v1532_v40, %v253_v44  ;;  %v368_v2 = vmax.f32 %v1563_v62, 0.0 }
  0xb8   :  { %v361_v46 = vmax.f32 %v345_v45, 0.0  ;;  %888 = vst [vmem:[%s1894_s10 + $0x40] sm:$0xff] %v368_v2 }
  0xba   :  { %v392_v47 = vpack.c.bf16 %v361_v46, %v360_v43  ;;  %881 = vst [vmem:[%s1894_s10 + $0x8] sm:$0xff] %v361_v46 }
  0xbb   :  { %v273_v6 = vpop.f32.mrf.mxu2 }
  0xbc   :  { %460 = vmatmul.bf16.vlgmr.msrb.gmra.mxu2 %v392_v47  ;;  %v1585_v9 = vadd.f32 %v1532_v40, %v273_v6 }
  0xbd   :  { %v256_v48 = vpop.f32.mrf.mxu0 }
  0xbe   :  { %v346_v49 = vadd.f32 %v1532_v40, %v256_v48  ;;  %v369_v13 = vmax.f32 %v1585_v9, 0.0  ;;  %v1162_v9 = vld [vmem:[#allocation4 + $0x78] sm:$0xf0] }
  0xc0   :  { %v362_v50 = vmax.f32 %v346_v49, 0.0  ;;  %889 = vst [vmem:[%s1894_s10 + $0x48] sm:$0xff] %v369_v13  ;;  %v396_v0 = vpack.c.bf16 %v369_v13, %v368_v2  ;;  %v1129_v13 = vor.u32 %v1237_v11, %v1128_v10 }
  0xc2   :  { %882 = vst [vmem:[%s1894_s10 + $0x10] sm:$0xff] %v362_v50 }
  0xc3   :  { %v276_v18 = vpop.f32.mrf.mxu2  ;;  %324 = vmatmul.bf16.gmra.mxu3 %v1507_v31  ;;  %304 = vmatmul.bf16.gmra.mxu1 %v1490_v25  ;;  %v1144_v31 = vld [vmem:[#allocation4 + $0x50] sm:$0xf]  ;;  %v1241_v25 = vld [vmem:[#allocation4 + $0x54] sm:$0xf0] }
  0xc4   :  { %v1610_v21 = vadd.f32 %v1532_v40, %v276_v18  ;;  %v1145_v3 = vor.u32 %v1241_v25, %v1144_v31  ;;  %v1240_v18 = vld [vmem:[#allocation4 + $0x54] sm:$0xf] }
  0xc5   :  { %v258_v54 = vpop.f32.mrf.mxu0 }
  0xc6   :  { %v347_v56 = vadd.f32 %v1532_v40, %v258_v54  ;;  %v370_v23 = vmax.f32 %v1610_v21, 0.0  ;;  %v1161_v54 = vor.u32 %v1245_v26, %v1160_v24 }
  0xc8   :  { %v363_v60 = vmax.f32 %v347_v56, 0.0  ;;  %890 = vst [vmem:[%s1894_s10 + $0x50] sm:$0xff] %v370_v23  ;;  %v1243_v56 = vld [vmem:[#allocation4 + $0x64] sm:$0xf0]  ;;  %605 = vmatpush.bf16.msrb.mxu3 %v1161_v54 }
  0xc9   :  { %v1153_v58 = vor.u32 %v1243_v56, %v1152_v53 }
  0xca   :  { %883 = vst [vmem:[%s1894_s10 + $0x18] sm:$0xff] %v363_v60  ;;  %v393_v61 = vpack.c.bf16 %v363_v60, %v362_v50 }
  0xcb   :  { %v278_v39 = vpop.f32.mrf.mxu2 }
  0xcc   :  { %465 = vmatmul.bf16.gmra.mxu2 %v393_v61  ;;  %v355_v43 = vadd.f32 %v1532_v40, %v278_v39  ;;  %606 = vmatpush.bf16.msrb.mxu3 %v1153_v58  ;;  %v1122_v39 = vld [vmem:[#allocation4 + $0x28] sm:$0xf0] }
  0xcd   :  { %v261_v5 = vpop.f32.mrf.mxu0 }
  0xce   :  { %v348_v8 = vadd.f32 %v1532_v40, %v261_v5  ;;  %v371_v45 = vmax.f32 %v355_v43, 0.0  ;;  %v1239_v5 = vld [vmem:[#allocation4 + $0x44] sm:$0xf0] }
  0xcf   :  { %v1137_v62 = vor.u32 %v1239_v5, %v1136_v1  ;;  %v1231_v43 = vld [vmem:[#allocation4 + $0x4] sm:$0xf0] }
  0xd0   :  { %v364_v12 = vmax.f32 %v348_v8, 0.0  ;;  %891 = vst [vmem:[%s1894_s10 + $0x58] sm:$0xff] %v371_v45  ;;  %607 = vmatpush.bf16.msrb.mxu3 %v1145_v3  ;;  %v397_v7 = vpack.c.bf16 %v371_v45, %v370_v23  ;;  %v1244_v8 = vld [vmem:[#allocation4 + $0x74] sm:$0xf]  ;;  %v1138_v23 = vld [vmem:[#allocation4 + $0x48] sm:$0xf0] }
  0xd2   :  { %884 = vst [vmem:[%s1894_s10 + $0x20] sm:$0xff] %v364_v12 }
  0xd3   :  { %v281_v47 = vpop.f32.mrf.mxu2  ;;  %329 = vmatmul.bf16.gmra.mxu3 %v1519_v37  ;;  %309 = vmatmul.bf16.gmra.mxu1 %v1502_v30  ;;  %v1146_v37 = vld [vmem:[#allocation4 + $0x58] sm:$0xf0]  ;;  %v1121_v30 = vor.u32 %v1235_v16, %v1120_v15 }
  0xd4   :  { %v1645_v49 = vadd.f32 %v1532_v40, %v281_v47  ;;  %608 = vmatpush.bf16.msrb.mxu3 %v1137_v62  ;;  %v1149_v21 = vor.u32 %v1240_v18, %v1146_v37  ;;  %v1106_v47 = vld [vmem:[#allocation4 + $0x8] sm:$0xf0] }
  0xd5   :  { %v263_v17 = vpop.f32.mrf.mxu0  ;;  %v1251_v37 = vld [vmem:[#allocation6 + $0x28] sm:$0xff] }
  0xd6   :  { %v349_v20 = vadd.f32 %v1532_v40, %v263_v17  ;;  %v372_v51 = vmax.f32 %v1645_v49, 0.0 }
  0xd8   :  { %v365_v22 = vmax.f32 %v349_v20, 0.0  ;;  %892 = vst [vmem:[%s1894_s10 + $0x60] sm:$0xff] %v372_v51  ;;  %609 = vmatpush.bf16.msrb.mxu3 %v1129_v13  ;;  %v1233_v20 = vld [vmem:[#allocation4 + $0x14] sm:$0xf0] }
  0xda   :  { %885 = vst [vmem:[%s1894_s10 + $0x28] sm:$0xff] %v365_v22  ;;  %v394_v27 = vpack.c.bf16 %v365_v22, %v364_v12  ;;  %v1242_v12 = vld [vmem:[#allocation4 + $0x64] sm:$0xf] }
  0xdb   :  { %v283_v55 = vpop.f32.mrf.mxu2  ;;  %v1157_v17 = vor.u32 %v1242_v12, %v1154_v14  ;;  %v1238_v22 = vld [vmem:[#allocation4 + $0x44] sm:$0xf]  ;;  %v1252_v12 = vld [vmem:[#allocation6 + $0x30] sm:$0xff] }
  0xdc   :  { %470 = vmatmul.bf16.gmra.mxu2 %v394_v27  ;;  %v1657_v57 = vadd.f32 %v1532_v40, %v283_v55  ;;  %610 = vmatpush.bf16.msrb.mxu3 %v1121_v30  ;;  %v1113_v27 = vor.u32 %v1233_v20, %v1112_v19  ;;  %v1141_v28 = vor.u32 %v1238_v22, %v1138_v23 }
  0xdd   :  { %v266_v36 = vpop.f32.mrf.mxu0 }
  0xde   :  { %v350_v42 = vadd.f32 %v1532_v40, %v266_v36  ;;  %v373_v59 = vmax.f32 %v1657_v57, 0.0  ;;  %v1234_v36 = vld [vmem:[#allocation4 + $0x24] sm:$0xf] }
  0xdf   :  { %v1125_v41 = vor.u32 %v1234_v36, %v1122_v39 }
  0xe0   :  { %v366_v44 = vmax.f32 %v350_v42, 0.0  ;;  %893 = vst [vmem:[%s1894_s10 + $0x68] sm:$0xff] %v373_v59  ;;  %611 = vmatpush.bf16.msrb.mxu3 %v1113_v27  ;;  %v398_v34 = vpack.c.bf16 %v373_v59, %v372_v51  ;;  %v1104_v42 = vld [vmem:[#allocation4] sm:$0xf] }
  0xe1   :  { %v1698_v51 = vld [vmem:[%s1888_s4] ss:$0 sm:$0xff] }
  0xe2   :  { %886 = vst [vmem:[%s1894_s10 + $0x30] sm:$0xff] %v366_v44 }
  0xe3   :  { %v286_v60 = vpop.f32.mrf.mxu2  ;;  %334 = vmatmul.bf16.gmra.mxu3 %v1526_v38  ;;  %314 = vmatmul.bf16.gmra.mxu1 %v1514_v35  ;;  %v1232_v38 = vld [vmem:[#allocation4 + $0x14] sm:$0xf]  ;;  %v1105_v35 = vor.u32 %v1231_v43, %v1104_v42 }
  0xe4   :  { %v1666_v61 = vadd.f32 %v1532_v40, %v286_v60 }
  0xe5   :  { %v268_v46 = vpop.f32.mrf.mxu0  ;;  %612 = vmatpush.bf16.msrb.mxu3 %v1105_v35 }
  0xe6   :  { %v351_v48 = vadd.f32 %v1532_v40, %v268_v46  ;;  %v374_v63 = vmax.f32 %v1666_v61, 0.0  ;;  %v1230_v46 = vld [vmem:[#allocation4 + $0x4] sm:$0xf] }
  0xe8   :  { %v367_v50 = vmax.f32 %v351_v48, 0.0  ;;  %894 = vst [vmem:[%s1894_s10 + $0x70] sm:$0xff] %v374_v63  ;;  %v1109_v48 = vor.u32 %v1230_v46, %v1106_v47  ;;  %v1246_v46 = vld [vmem:[#allocation6] sm:$0xff] }
  0xea   :  { %887 = vst [vmem:[%s1894_s10 + $0x38] sm:$0xff] %v367_v50  ;;  %v395_v52 = vpack.c.bf16 %v367_v50, %v366_v44  ;;  %v1114_v44 = vld [vmem:[#allocation4 + $0x18] sm:$0xf0] }
  0xeb   :  { %v288_v4 = vpop.f32.mrf.mxu2  ;;  %v1117_v45 = vor.u32 %v1232_v38, %v1114_v44  ;;  %v1247_v44 = vld [vmem:[#allocation6 + $0x8] sm:$0xff] }
  0xec   :  { %475 = vmatmul.bf16.gmra.mxu2 %v395_v52  ;;  %v1679_v6 = vadd.f32 %v1532_v40, %v288_v4  ;;  %v1165_v40 = vor.u32 %v1244_v8, %v1162_v9  ;;  %v1253_v9 = vld [vmem:[#allocation6 + $0x38] sm:$0xff] }
  0xed   :  { %815 = vmatpush.bf16.msrb.mxu1 %v1253_v9 }
  0xee   :  { %v375_v2 = vmax.f32 %v1679_v6, 0.0  ;;  %654 = vmatpush.bf16.msrb.mxu0 %v1165_v40 }
  0xf0   :  { %895 = vst [vmem:[%s1894_s10 + $0x78] sm:$0xff] %v375_v2  ;;  %v399_v49 = vpack.c.bf16 %v375_v2, %v374_v63 }
  0xf1   :  { %816 = vmatpush.bf16.msrb.mxu1 %v1252_v12 }
  0xf2   :  { %655 = vmatpush.bf16.msrb.mxu0 %v1157_v17 }
  0xf5   :  { %817 = vmatpush.bf16.msrb.mxu1 %v1251_v37 }
  0xf6   :  { %656 = vmatpush.bf16.msrb.mxu0 %v1149_v21  ;;  %v1250_v21 = vld [vmem:[#allocation6 + $0x20] sm:$0xff] }
  0xf9   :  { %818 = vmatpush.bf16.msrb.mxu1 %v1250_v21 }
  0xfa   :  { %657 = vmatpush.bf16.msrb.mxu0 %v1141_v28 }
  0xfc   :  { %480 = vmatmul.bf16.gmra.mxu2 %v396_v0 }
  0xfe   :  { %658 = vmatpush.bf16.msrb.mxu0 %v1133_v33  ;;  %v1249_v33 = vld [vmem:[#allocation6 + $0x18] sm:$0xff] }
  0xff   :  { %819 = vmatpush.bf16.msrb.mxu1 %v1249_v33 }
 0x102   :  { %659 = vmatpush.bf16.msrb.mxu0 %v1125_v41 }
 0x106   :  { %660 = vmatpush.bf16.msrb.mxu0 %v1117_v45 }
 0x10a   :  { %661 = vmatpush.bf16.msrb.mxu0 %v1109_v48 }
 0x10c   :  { %485 = vmatmul.bf16.gmra.mxu2 %v397_v7 }
 0x11c   :  { %490 = vmatmul.bf16.gmra.mxu2 %v398_v34  ;;  %v1248_v34 = vld [vmem:[#allocation6 + $0x10] sm:$0xff] }
 0x11d   :  { %820 = vmatpush.bf16.msrb.mxu1 %v1248_v34 }
 0x121   :  { %821 = vmatpush.bf16.msrb.mxu1 %v1247_v44 }
 0x125   :  { %822 = vmatpush.bf16.msrb.mxu1 %v1246_v46 }
 0x12c   :  { %495 = vmatmul.bf16.gmra.mxu2 %v399_v49 }
 0x136   :  { %v320_v61 = vpop.f32.mrf.mxu3 }
 0x137   :  { %v904_v31 = vpack.c.bf16 %v320_v61, %v320_v61 }
 0x139   :  { %920 = vst [vmem:[%s1895_s11 + $0x40] sm:$0xf] %v904_v31 }
 0x13e   :  { %v322_v3 = vpop.f32.mrf.mxu3 }
 0x13f   :  { %v461_v50 = vpop.f32.mrf.mxu2  ;;  %v905_v4 = vpack.c.bf16 %v322_v3, %v322_v3 }
 0x140   :  { %v462_v24 = vadd.f32 %v1698_v51, %v461_v50 }
 0x141   :  { %921 = vst [vmem:[%s1895_s11 + $0x48] sm:$0xf] %v905_v4 }
 0x146   :  { %v325_v6 = vpop.f32.mrf.mxu3 }
 0x147   :  { %v463_v52 = vpop.f32.mrf.mxu2  ;;  %v906_v7 = vpack.c.bf16 %v325_v6, %v325_v6 }
 0x148   :  { %v464_v26 = vadd.f32 %v1698_v51, %v463_v52 }
 0x149   :  { %922 = vst [vmem:[%s1895_s11 + $0x50] sm:$0xf] %v906_v7 }
 0x14a   :  { %v517_v53 = vpack.c.bf16 %v464_v26, %v462_v24 }
 0x14c   :  { %613 = vmatmul.bf16.vlgmr.msrb.gmra.mxu3 %v517_v53  ;;  %662 = vmatmul.bf16.vlgmr.msrb.gmra.mxu0 %v517_v53 }
 0x14e   :  { %v327_v10 = vpop.f32.mrf.mxu3 }
 0x14f   :  { %v466_v54 = vpop.f32.mrf.mxu2  ;;  %v907_v11 = vpack.c.bf16 %v327_v10, %v327_v10  ;;  %v300_v10 = vpop.f32.mrf.mxu1 }
 0x150   :  { %v467_v56 = vadd.f32 %v1698_v51, %v466_v54  ;;  %v1746_v54 = vld [vmem:[%s1890_s6] ss:$0 sm:$0xff] }
 0x151   :  { %923 = vst [vmem:[%s1895_s11 + $0x58] sm:$0xf] %v907_v11  ;;  %v896_v11 = vpack.c.bf16 %v300_v10, %v300_v10 }
 0x153   :  { %912 = vst [vmem:[%s1895_s11] sm:$0xf] %v896_v11 }
 0x156   :  { %v330_v14 = vpop.f32.mrf.mxu3 }
 0x157   :  { %v468_v55 = vpop.f32.mrf.mxu2  ;;  %v908_v17 = vpack.c.bf16 %v330_v14, %v330_v14  ;;  %v302_v37 = vpop.f32.mrf.mxu1 }
 0x158   :  { %v469_v57 = vadd.f32 %v1698_v51, %v468_v55 }
 0x159   :  { %924 = vst [vmem:[%s1895_s11 + $0x60] sm:$0xf] %v908_v17 }
 0x15a   :  { %v518_v58 = vpack.c.bf16 %v469_v57, %v467_v56 }
 0x15c   :  { %618 = vmatmul.bf16.gmra.mxu3 %v518_v58  ;;  %667 = vmatmul.bf16.gmra.mxu0 %v518_v58 }
 0x15e   :  { %v332_v19 = vpop.f32.mrf.mxu3 }
 0x15f   :  { %v471_v59 = vpop.f32.mrf.mxu2  ;;  %v909_v20 = vpack.c.bf16 %v332_v19, %v332_v19  ;;  %v897_v19 = vpack.c.bf16 %v302_v37, %v302_v37 }
 0x160   :  { %v472_v63 = vadd.f32 %v1698_v51, %v471_v59 }
 0x161   :  { %925 = vst [vmem:[%s1895_s11 + $0x68] sm:$0xf] %v909_v20 }
 0x162   :  { %913 = vst [vmem:[%s1895_s11 + $0x8] sm:$0xf] %v897_v19 }
 0x166   :  { %v335_v23 = vpop.f32.mrf.mxu3 }
 0x167   :  { %v473_v60 = vpop.f32.mrf.mxu2  ;;  %v910_v29 = vpack.c.bf16 %v335_v23, %v335_v23  ;;  %v305_v23 = vpop.f32.mrf.mxu1 }
 0x168   :  { %v474_v0 = vadd.f32 %v1698_v51, %v473_v60 }
 0x169   :  { %926 = vst [vmem:[%s1895_s11 + $0x70] sm:$0xf] %v910_v29 }
 0x16a   :  { %v519_v25 = vpack.c.bf16 %v474_v0, %v472_v63 }
 0x16c   :  { %623 = vmatmul.bf16.gmra.mxu3 %v519_v25  ;;  %672 = vmatmul.bf16.gmra.mxu0 %v519_v25 }
 0x16e   :  { %v337_v39 = vpop.f32.mrf.mxu3 }
 0x16f   :  { %v476_v1 = vpop.f32.mrf.mxu2  ;;  %v911_v41 = vpack.c.bf16 %v337_v39, %v337_v39 }
 0x170   :  { %v477_v62 = vadd.f32 %v1698_v51, %v476_v1 }
 0x171   :  { %927 = vst [vmem:[%s1895_s11 + $0x78] sm:$0xf] %v911_v41  ;;  %v307_v41 = vpop.f32.mrf.mxu1 }
 0x177   :  { %v478_v5 = vpop.f32.mrf.mxu2 }
 0x178   :  { %v479_v2 = vadd.f32 %v1698_v51, %v478_v5 }
 0x17a   :  { %v520_v8 = vpack.c.bf16 %v479_v2, %v477_v62 }
 0x17c   :  { %628 = vmatmul.bf16.gmra.mxu3 %v520_v8  ;;  %677 = vmatmul.bf16.gmra.mxu0 %v520_v8 }
 0x17f   :  { %v481_v40 = vpop.f32.mrf.mxu2 }
 0x180   :  { %v482_v15 = vadd.f32 %v1698_v51, %v481_v40 }
 0x187   :  { %v483_v13 = vpop.f32.mrf.mxu2 }
 0x188   :  { %v484_v16 = vadd.f32 %v1698_v51, %v483_v13 }
 0x18a   :  { %v521_v18 = vpack.c.bf16 %v484_v16, %v482_v15 }
 0x18c   :  { %633 = vmatmul.bf16.gmra.mxu3 %v521_v18  ;;  %682 = vmatmul.bf16.gmra.mxu0 %v521_v18 }
 0x18f   :  { %v486_v30 = vpop.f32.mrf.mxu2 }
 0x190   :  { %v487_v27 = vadd.f32 %v1698_v51, %v486_v30 }
 0x197   :  { %v488_v22 = vpop.f32.mrf.mxu2 }
 0x198   :  { %v489_v28 = vadd.f32 %v1698_v51, %v488_v22 }
 0x19a   :  { %v522_v32 = vpack.c.bf16 %v489_v28, %v487_v27  ;;  %v898_v27 = vpack.c.bf16 %v305_v23, %v305_v23 }
 0x19c   :  { %638 = vmatmul.bf16.gmra.mxu3 %v522_v32  ;;  %687 = vmatmul.bf16.gmra.mxu0 %v522_v32  ;;  %914 = vst [vmem:[%s1895_s11 + $0x10] sm:$0xf] %v898_v27 }
 0x19f   :  { %v491_v36 = vpop.f32.mrf.mxu2 }
 0x1a0   :  { %v492_v43 = vadd.f32 %v1698_v51, %v491_v36 }
 0x1a7   :  { %v493_v42 = vpop.f32.mrf.mxu2 }
 0x1a8   :  { %v494_v38 = vadd.f32 %v1698_v51, %v493_v42 }
 0x1aa   :  { %v523_v35 = vpack.c.bf16 %v494_v38, %v492_v43  ;;  %v899_v43 = vpack.c.bf16 %v307_v41, %v307_v41 }
 0x1ac   :  { %643 = vmatmul.bf16.gmra.mxu3 %v523_v35  ;;  %692 = vmatmul.bf16.gmra.mxu0 %v523_v35  ;;  %915 = vst [vmem:[%s1895_s11 + $0x18] sm:$0xf] %v899_v43 }
 0x1af   :  { %v496_v45 = vpop.f32.mrf.mxu2 }
 0x1b0   :  { %v497_v48 = vadd.f32 %v1698_v51, %v496_v45  ;;  %v310_v45 = vpop.f32.mrf.mxu1 }
 0x1b1   :  { %v900_v46 = vpack.c.bf16 %v310_v45, %v310_v45 }
 0x1b3   :  { %916 = vst [vmem:[%s1895_s11 + $0x20] sm:$0xf] %v900_v46 }
 0x1b7   :  { %v498_v47 = vpop.f32.mrf.mxu2 }
 0x1b8   :  { %v499_v49 = vadd.f32 %v1698_v51, %v498_v47 }
 0x1ba   :  { %v524_v50 = vpack.c.bf16 %v499_v49, %v497_v48 }
 0x1bc   :  { %648 = vmatmul.bf16.gmra.mxu3 %v524_v50  ;;  %697 = vmatmul.bf16.gmra.mxu0 %v524_v50 }
 0x1c9   :  { %v663_v52 = vpop.f32.mrf.mxu0 }
 0x1ca   :  { %v928_v24 = vpack.c.bf16 %v663_v52, %v663_v52 }
 0x1cc   :  { %944 = vst [vmem:[%s1895_s11 + $0x4] sm:$0xf] %v928_v24 }
 0x1cf   :  { %v614_v26 = vpop.f32.mrf.mxu3 }
 0x1d0   :  { %v707_v51 = vadd.f32 %v1746_v54, %v614_v26 }
 0x1d1   :  { %v665_v53 = vpop.f32.mrf.mxu0 }
 0x1d2   :  { %v929_v55 = vpack.c.bf16 %v665_v53, %v665_v53  ;;  %v723_v59 = vmax.f32 %v707_v51, 0.0  ;;  %v312_v53 = vpop.f32.mrf.mxu1 }
 0x1d3   :  { %v901_v51 = vpack.c.bf16 %v312_v53, %v312_v53 }
 0x1d4   :  { %945 = vst [vmem:[%s1895_s11 + $0xc] sm:$0xf] %v929_v55 }
 0x1d5   :  { %917 = vst [vmem:[%s1895_s11 + $0x28] sm:$0xf] %v901_v51 }
 0x1d7   :  { %v616_v56 = vpop.f32.mrf.mxu3 }
 0x1d8   :  { %v708_v57 = vadd.f32 %v1746_v54, %v616_v56 }
 0x1d9   :  { %v668_v58 = vpop.f32.mrf.mxu0 }
 0x1da   :  { %v724_v60 = vmax.f32 %v708_v57, 0.0  ;;  %v930_v61 = vpack.c.bf16 %v668_v58, %v668_v58 }
 0x1dc   :  { %v755_v63 = vpack.c.bf16 %v724_v60, %v723_v59  ;;  %946 = vst [vmem:[%s1895_s11 + $0x14] sm:$0xf] %v930_v61  ;;  %v315_v59 = vpop.f32.mrf.mxu1 }
 0x1dd   :  { %v902_v60 = vpack.c.bf16 %v315_v59, %v315_v59 }
 0x1de   :  { %823 = vmatmul.bf16.vlgmr.msrb.gmra.mxu1 %v755_v63 }
 0x1df   :  { %v619_v0 = vpop.f32.mrf.mxu3  ;;  %918 = vst [vmem:[%s1895_s11 + $0x30] sm:$0xf] %v902_v60 }
 0x1e0   :  { %v709_v1 = vadd.f32 %v1746_v54, %v619_v0 }
 0x1e1   :  { %v670_v31 = vpop.f32.mrf.mxu0 }
 0x1e2   :  { %v931_v25 = vpack.c.bf16 %v670_v31, %v670_v31  ;;  %v725_v6 = vmax.f32 %v709_v1, 0.0 }
 0x1e4   :  { %947 = vst [vmem:[%s1895_s11 + $0x1c] sm:$0xf] %v931_v25 }
 0x1e7   :  { %v621_v3 = vpop.f32.mrf.mxu3 }
 0x1e8   :  { %v710_v4 = vadd.f32 %v1746_v54, %v621_v3 }
 0x1e9   :  { %v673_v5 = vpop.f32.mrf.mxu0 }
 0x1ea   :  { %v726_v62 = vmax.f32 %v710_v4, 0.0  ;;  %v932_v2 = vpack.c.bf16 %v673_v5, %v673_v5  ;;  %v317_v4 = vpop.f32.mrf.mxu1 }
 0x1ec   :  { %948 = vst [vmem:[%s1895_s11 + $0x24] sm:$0xf] %v932_v2  ;;  %v756_v7 = vpack.c.bf16 %v726_v62, %v725_v6  ;;  %v903_v6 = vpack.c.bf16 %v317_v4, %v317_v4 }
 0x1ee   :  { %828 = vmatmul.bf16.gmra.mxu1 %v756_v7  ;;  %919 = vst [vmem:[%s1895_s11 + $0x38] sm:$0xf] %v903_v6 }
 0x1ef   :  { %v624_v8 = vpop.f32.mrf.mxu3 }
 0x1f0   :  { %v711_v12 = vadd.f32 %v1746_v54, %v624_v8 }
 0x1f1   :  { %v675_v9 = vpop.f32.mrf.mxu0 }
 0x1f2   :  { %v933_v40 = vpack.c.bf16 %v675_v9, %v675_v9  ;;  %v727_v16 = vmax.f32 %v711_v12, 0.0 }
 0x1f4   :  { %949 = vst [vmem:[%s1895_s11 + $0x2c] sm:$0xf] %v933_v40 }
 0x1f7   :  { %v626_v13 = vpop.f32.mrf.mxu3 }
 0x1f8   :  { %v712_v14 = vadd.f32 %v1746_v54, %v626_v13 }
 0x1f9   :  { %v678_v15 = vpop.f32.mrf.mxu0 }
 0x1fa   :  { %v728_v17 = vmax.f32 %v712_v14, 0.0  ;;  %v934_v18 = vpack.c.bf16 %v678_v15, %v678_v15 }
 0x1fc   :  { %950 = vst [vmem:[%s1895_s11 + $0x34] sm:$0xf] %v934_v18  ;;  %v757_v30 = vpack.c.bf16 %v728_v17, %v727_v16 }
 0x1fe   :  { %833 = vmatmul.bf16.gmra.mxu1 %v757_v30 }
 0x1ff   :  { %v629_v20 = vpop.f32.mrf.mxu3 }
 0x200   :  { %v713_v28 = vadd.f32 %v1746_v54, %v629_v20 }
 0x201   :  { %v680_v21 = vpop.f32.mrf.mxu0 }
 0x202   :  { %v935_v22 = vpack.c.bf16 %v680_v21, %v680_v21  ;;  %v729_v34 = vmax.f32 %v713_v28, 0.0 }
 0x204   :  { %951 = vst [vmem:[%s1895_s11 + $0x3c] sm:$0xf] %v935_v22  ;;  %v1280_v22 = vld [vmem:[%s1892_s8] ss:$0 sm:$0xff] }
 0x207   :  { %v631_v29 = vpop.f32.mrf.mxu3 }
 0x208   :  { %v714_v32 = vadd.f32 %v1746_v54, %v631_v29 }
 0x209   :  { %v683_v33 = vpop.f32.mrf.mxu0 }
 0x20a   :  { %v730_v36 = vmax.f32 %v714_v32, 0.0  ;;  %v936_v39 = vpack.c.bf16 %v683_v33, %v683_v33 }
 0x20c   :  { %952 = vst [vmem:[%s1895_s11 + $0x44] sm:$0xf] %v936_v39  ;;  %v758_v42 = vpack.c.bf16 %v730_v36, %v729_v34 }
 0x20e   :  { %838 = vmatmul.bf16.gmra.mxu1 %v758_v42 }
 0x20f   :  { %v634_v38 = vpop.f32.mrf.mxu3 }
 0x210   :  { %v715_v47 = vadd.f32 %v1746_v54, %v634_v38 }
 0x211   :  { %v685_v35 = vpop.f32.mrf.mxu0 }
 0x212   :  { %v937_v44 = vpack.c.bf16 %v685_v35, %v685_v35  ;;  %v731_v52 = vmax.f32 %v715_v47, 0.0 }
 0x214   :  { %953 = vst [vmem:[%s1895_s11 + $0x4c] sm:$0xf] %v937_v44 }
 0x217   :  { %v636_v48 = vpop.f32.mrf.mxu3 }
 0x218   :  { %v716_v49 = vadd.f32 %v1746_v54, %v636_v48 }
 0x219   :  { %v688_v50 = vpop.f32.mrf.mxu0 }
 0x21a   :  { %v732_v24 = vmax.f32 %v716_v49, 0.0  ;;  %v938_v26 = vpack.c.bf16 %v688_v50, %v688_v50 }
 0x21c   :  { %954 = vst [vmem:[%s1895_s11 + $0x54] sm:$0xf] %v938_v26  ;;  %v759_v55 = vpack.c.bf16 %v732_v24, %v731_v52 }
 0x21e   :  { %843 = vmatmul.bf16.gmra.mxu1 %v759_v55 }
 0x21f   :  { %v639_v56 = vpop.f32.mrf.mxu3 }
 0x220   :  { %v717_v61 = vadd.f32 %v1746_v54, %v639_v56 }
 0x221   :  { %v690_v57 = vpop.f32.mrf.mxu0 }
 0x222   :  { %v939_v58 = vpack.c.bf16 %v690_v57, %v690_v57  ;;  %v733_v25 = vmax.f32 %v717_v61, 0.0 }
 0x224   :  { %955 = vst [vmem:[%s1895_s11 + $0x5c] sm:$0xf] %v939_v58 }
 0x227   :  { %v641_v63 = vpop.f32.mrf.mxu3 }
 0x228   :  { %v718_v0 = vadd.f32 %v1746_v54, %v641_v63 }
 0x229   :  { %v693_v31 = vpop.f32.mrf.mxu0 }
 0x22a   :  { %v734_v1 = vmax.f32 %v718_v0, 0.0  ;;  %v940_v3 = vpack.c.bf16 %v693_v31, %v693_v31 }
 0x22c   :  { %956 = vst [vmem:[%s1895_s11 + $0x64] sm:$0xf] %v940_v3  ;;  %v760_v5 = vpack.c.bf16 %v734_v1, %v733_v25 }
 0x22e   :  { %848 = vmatmul.bf16.gmra.mxu1 %v760_v5 }
 0x22f   :  { %v644_v62 = vpop.f32.mrf.mxu3 }
 0x230   :  { %v719_v8 = vadd.f32 %v1746_v54, %v644_v62 }
 0x231   :  { %v695_v2 = vpop.f32.mrf.mxu0 }
 0x232   :  { %v941_v7 = vpack.c.bf16 %v695_v2, %v695_v2  ;;  %v735_v11 = vmax.f32 %v719_v8, 0.0 }
 0x234   :  { %957 = vst [vmem:[%s1895_s11 + $0x6c] sm:$0xf] %v941_v7 }
 0x237   :  { %v646_v9 = vpop.f32.mrf.mxu3 }
 0x238   :  { %v720_v40 = vadd.f32 %v1746_v54, %v646_v9 }
 0x239   :  { %v698_v10 = vpop.f32.mrf.mxu0 }
 0x23a   :  { %v736_v12 = vmax.f32 %v720_v40, 0.0  ;;  %v942_v13 = vpack.c.bf16 %v698_v10, %v698_v10 }
 0x23c   :  { %958 = vst [vmem:[%s1895_s11 + $0x74] sm:$0xf] %v942_v13  ;;  %v761_v14 = vpack.c.bf16 %v736_v12, %v735_v11 }
 0x23e   :  { %853 = vmatmul.bf16.gmra.mxu1 %v761_v14 }
 0x23f   :  { %v649_v15 = vpop.f32.mrf.mxu3 }
 0x240   :  { %v721_v18 = vadd.f32 %v1746_v54, %v649_v15 }
 0x241   :  { %v700_v16 = vpop.f32.mrf.mxu0 }
 0x242   :  { %v943_v17 = vpack.c.bf16 %v700_v16, %v700_v16  ;;  %v737_v19 = vmax.f32 %v721_v18, 0.0 }
 0x244   :  { %959 = vst [vmem:[%s1895_s11 + $0x7c] sm:$0xf] %v943_v17 }
 0x247   :  { %v651_v37 = vpop.f32.mrf.mxu3 }
 0x248   :  { %v722_v30 = vadd.f32 %v1746_v54, %v651_v37 }
 0x24a   :  { %v738_v20 = vmax.f32 %v722_v30, 0.0 }
 0x24c   :  { %v762_v21 = vpack.c.bf16 %v738_v20, %v737_v19 }
 0x24e   :  { %858 = vmatmul.bf16.gmra.mxu1 %v762_v21 }
 0x25b   :  { %v824_v23 = vpop.f32.mrf.mxu1 }
 0x25c   :  { %v825_v27 = vadd.f32 %v1280_v22, %v824_v23 }
 0x25e   :  { %864 = vst [vmem:[%s1893_s9] sm:$0xff] %v825_v27 }
 0x263   :  { %v826_v28 = vpop.f32.mrf.mxu1 }
 0x264   :  { %v827_v29 = vadd.f32 %v1280_v22, %v826_v28 }
 0x266   :  { %865 = vst [vmem:[%s1893_s9 + $0x8] sm:$0xff] %v827_v29 }
 0x26b   :  { %v829_v54 = vpop.f32.mrf.mxu1 }
 0x26c   :  { %v830_v32 = vadd.f32 %v1280_v22, %v829_v54 }
 0x26e   :  { %866 = vst [vmem:[%s1893_s9 + $0x10] sm:$0xff] %v830_v32 }
 0x273   :  { %v831_v33 = vpop.f32.mrf.mxu1 }
 0x274   :  { %v832_v34 = vadd.f32 %v1280_v22, %v831_v33 }
 0x276   :  { %867 = vst [vmem:[%s1893_s9 + $0x18] sm:$0xff] %v832_v34 }
 0x27b   :  { %v834_v36 = vpop.f32.mrf.mxu1 }
 0x27c   :  { %v835_v39 = vadd.f32 %v1280_v22, %v834_v36 }
 0x27e   :  { %868 = vst [vmem:[%s1893_s9 + $0x20] sm:$0xff] %v835_v39 }
 0x283   :  { %v836_v41 = vpop.f32.mrf.mxu1 }
 0x284   :  { %v837_v42 = vadd.f32 %v1280_v22, %v836_v41 }
 0x286   :  { %869 = vst [vmem:[%s1893_s9 + $0x28] sm:$0xff] %v837_v42 }
 0x28b   :  { %v839_v43 = vpop.f32.mrf.mxu1 }
 0x28c   :  { %v840_v38 = vadd.f32 %v1280_v22, %v839_v43 }
 0x28e   :  { %870 = vst [vmem:[%s1893_s9 + $0x30] sm:$0xff] %v840_v38 }
 0x293   :  { %v841_v35 = vpop.f32.mrf.mxu1 }
 0x294   :  { %v842_v44 = vadd.f32 %v1280_v22, %v841_v35 }
 0x296   :  { %871 = vst [vmem:[%s1893_s9 + $0x38] sm:$0xff] %v842_v44 }
 0x29b   :  { %v844_v45 = vpop.f32.mrf.mxu1 }
 0x29c   :  { %v845_v46 = vadd.f32 %v1280_v22, %v844_v45 }
 0x29e   :  { %872 = vst [vmem:[%s1893_s9 + $0x40] sm:$0xff] %v845_v46 }
 0x2a3   :  { %v846_v47 = vpop.f32.mrf.mxu1 }
 0x2a4   :  { %v847_v48 = vadd.f32 %v1280_v22, %v846_v47 }
 0x2a6   :  { %873 = vst [vmem:[%s1893_s9 + $0x48] sm:$0xff] %v847_v48 }
 0x2ab   :  { %v849_v49 = vpop.f32.mrf.mxu1 }
 0x2ac   :  { %v850_v50 = vadd.f32 %v1280_v22, %v849_v49 }
 0x2ae   :  { %874 = vst [vmem:[%s1893_s9 + $0x50] sm:$0xff] %v850_v50 }
 0x2b3   :  { %v851_v52 = vpop.f32.mrf.mxu1 }
 0x2b4   :  { %v852_v24 = vadd.f32 %v1280_v22, %v851_v52 }
 0x2b6   :  { %875 = vst [vmem:[%s1893_s9 + $0x58] sm:$0xff] %v852_v24 }
 0x2bb   :  { %v854_v26 = vpop.f32.mrf.mxu1 }
 0x2bc   :  { %v855_v53 = vadd.f32 %v1280_v22, %v854_v26 }
 0x2be   :  { %876 = vst [vmem:[%s1893_s9 + $0x60] sm:$0xff] %v855_v53 }
 0x2c3   :  { %v856_v55 = vpop.f32.mrf.mxu1 }
 0x2c4   :  { %v857_v51 = vadd.f32 %v1280_v22, %v856_v55 }
 0x2c6   :  { %877 = vst [vmem:[%s1893_s9 + $0x68] sm:$0xff] %v857_v51 }
 0x2cb   :  { %v859_v56 = vpop.f32.mrf.mxu1 }
 0x2cc   :  { %v860_v57 = vadd.f32 %v1280_v22, %v859_v56 }
 0x2ce   :  { %878 = vst [vmem:[%s1893_s9 + $0x70] sm:$0xff] %v860_v57 }
 0x2d3   :  { %v861_v58 = vpop.f32.mrf.mxu1 }
 0x2d4   :  { %v862_v59 = vadd.f32 %v1280_v22, %v861_v58 }
 0x2d6   :  { %879 = vst [vmem:[%s1893_s9 + $0x78] sm:$0xff] %v862_v59 }
 0x2d7   :  { %972 = vsyncpa [#allocation3], 1 }
 0x2d8   :  { %973 = vsyncpa [#allocation5], 1 }

// kernel: _eas_gcn_forward_impl.4
= control target key start
LH: loop header
LB: loop body
LE: loop exit
PB: predicated region body
PF: predicated region fallthrough
CT: control target
= control target key end

     0   :  { %s1350_s1 = inlined_call_operand.vmem [shape: bf16[128,256], index: 1, kind: input, shape index: {}]   ;;  %s1351_s4 = inlined_call_operand.vmem [shape: f32[1,128], index: 4, kind: input, shape index: {}]   ;;  %s1352_s0 = inlined_call_operand.vmem [shape: bf16[128,128], index: 0, kind: input, shape index: {}]   ;;  %s1353_s3 = inlined_call_operand.vmem [shape: bf16[128,128], index: 3, kind: input, shape index: {}]   ;;  %s1354_s5 = inlined_call_operand.vmem [shape: f32[1,128], index: 5, kind: input, shape index: {}]   ;;  %s1355_s2 = inlined_call_operand.vmem [shape: f32[128,128], index: 2, kind: input, shape index: {}]   ;;  %s1356_s6 = inlined_call_operand.vmem [shape: f32[128,128], index: 6, kind: output, shape index: {0}]   ;;  %s1357_s7 = inlined_call_operand.vmem [shape: bf16[128,128], index: 7, kind: output, shape index: {1}]  }
   0x1   :  { %v829_v0 = vld [vmem:[%s1350_s1 + $0x70] sm:$0xf]  ;;  %v890_v1 = vld [vmem:[%s1350_s1 + $0x74] sm:$0xf0]  ;;  %v821_v2 = vld [vmem:[%s1350_s1 + $0x60] sm:$0xf] }
   0x2   :  { %v830_v3 = vor.u32 %v890_v1, %v829_v0  ;;  %v888_v4 = vld [vmem:[%s1350_s1 + $0x64] sm:$0xf0]  ;;  %v813_v6 = vld [vmem:[%s1350_s1 + $0x50] sm:$0xf]  ;;  %v886_v7 = vld [vmem:[%s1350_s1 + $0x54] sm:$0xf0] }
   0x3   :  { %v822_v5 = vor.u32 %v888_v4, %v821_v2  ;;  %v814_v8 = vor.u32 %v886_v7, %v813_v6  ;;  %v805_v9 = vld [vmem:[%s1350_s1 + $0x40] sm:$0xf]  ;;  %v884_v10 = vld [vmem:[%s1350_s1 + $0x44] sm:$0xf0]  ;;  %v797_v12 = vld [vmem:[%s1350_s1 + $0x30] sm:$0xf] }
   0x4   :  { %259 = vmatpush.bf16.msra.mxu0 %v830_v3  ;;  %946 = vmatpush.bf16.msra.mxu3 %v830_v3  ;;  %v806_v11 = vor.u32 %v884_v10, %v805_v9  ;;  %v882_v13 = vld [vmem:[%s1350_s1 + $0x34] sm:$0xf0]  ;;  %v789_v15 = vld [vmem:[%s1350_s1 + $0x20] sm:$0xf]  ;;  %v880_v16 = vld [vmem:[%s1350_s1 + $0x24] sm:$0xf0] }
   0x5   :  { %v798_v14 = vor.u32 %v882_v13, %v797_v12  ;;  %v790_v17 = vor.u32 %v880_v16, %v789_v15  ;;  %v781_v18 = vld [vmem:[%s1350_s1 + $0x10] sm:$0xf]  ;;  %v878_v19 = vld [vmem:[%s1350_s1 + $0x14] sm:$0xf0]  ;;  %v773_v21 = vld [vmem:[%s1350_s1] sm:$0xf] }
   0x6   :  { %v782_v20 = vor.u32 %v878_v19, %v781_v18  ;;  %v876_v22 = vld [vmem:[%s1350_s1 + $0x4] sm:$0xf0]  ;;  %v1063_v24 = vld [vmem:[%s1352_s0] sm:$0xff]  ;;  %v1069_v25 = vld [vmem:[%s1352_s0 + $0x30] sm:$0xff] }
   0x7   :  { %v774_v23 = vor.u32 %v876_v22, %v773_v21  ;;  %v1075_v26 = vld [vmem:[%s1352_s0 + $0x8] sm:$0xff]  ;;  %v1081_v27 = vld [vmem:[%s1352_s0 + $0x38] sm:$0xff]  ;;  %v1087_v28 = vld [vmem:[%s1352_s0 + $0x10] sm:$0xff] }
   0x8   :  { %260 = vmatpush.bf16.msra.mxu0 %v822_v5  ;;  %947 = vmatpush.bf16.msra.mxu3 %v822_v5  ;;  %v1093_v29 = vld [vmem:[%s1352_s0 + $0x18] sm:$0xff]  ;;  %v889_v30 = vld [vmem:[%s1350_s1 + $0x74] sm:$0xf]  ;;  %v887_v34 = vld [vmem:[%s1350_s1 + $0x64] sm:$0xf] }
   0x9   :  { %v831_v31 = vld [vmem:[%s1350_s1 + $0x78] sm:$0xf0]  ;;  %v823_v35 = vld [vmem:[%s1350_s1 + $0x68] sm:$0xf0]  ;;  %v897_v36 = vld [vmem:[%s1353_s3 + $0x30] sm:$0xff] }
   0xa   :  { %v898_v32 = vld [vmem:[%s1353_s3 + $0x38] sm:$0xff]  ;;  %v834_v33 = vor.u32 %v889_v30, %v831_v31  ;;  %v826_v37 = vor.u32 %v887_v34, %v823_v35  ;;  %v885_v38 = vld [vmem:[%s1350_s1 + $0x54] sm:$0xf]  ;;  %v896_v40 = vld [vmem:[%s1353_s3 + $0x28] sm:$0xff] }
   0xb   :  { %648 = vmatpush.bf16.msra.mxu2 %v898_v32  ;;  %v815_v39 = vld [vmem:[%s1350_s1 + $0x58] sm:$0xf0]  ;;  %v883_v42 = vld [vmem:[%s1350_s1 + $0x44] sm:$0xf]  ;;  %v807_v43 = vld [vmem:[%s1350_s1 + $0x48] sm:$0xf0] }
   0xc   :  { %261 = vmatpush.bf16.msra.mxu0 %v814_v8  ;;  %948 = vmatpush.bf16.msra.mxu3 %v814_v8  ;;  %v818_v41 = vor.u32 %v885_v38, %v815_v39  ;;  %v895_v44 = vld [vmem:[%s1353_s3 + $0x20] sm:$0xff]  ;;  %v810_v45 = vor.u32 %v883_v42, %v807_v43  ;;  %v1141_v47 = vld [vmem:[%s1352_s0 + $0x28] sm:$0xff]  ;;  %v881_v48 = vld [vmem:[%s1350_s1 + $0x34] sm:$0xf] }
   0xd   :  { %308 = vmatpush.bf16.msra.mxu1 %v834_v33  ;;  %v1135_v46 = vld [vmem:[%s1352_s0 + $0x20] sm:$0xff]  ;;  %v799_v49 = vld [vmem:[%s1350_s1 + $0x38] sm:$0xf0]  ;;  %v791_v53 = vld [vmem:[%s1350_s1 + $0x28] sm:$0xf0] }
   0xe   :  { %v802_v50 = vor.u32 %v881_v48, %v799_v49  ;;  %v894_v51 = vld [vmem:[%s1353_s3 + $0x18] sm:$0xff]  ;;  %v879_v52 = vld [vmem:[%s1350_s1 + $0x24] sm:$0xf]  ;;  %v893_v55 = vld [vmem:[%s1353_s3 + $0x10] sm:$0xff] }
   0xf   :  { %649 = vmatpush.bf16.msra.mxu2 %v897_v36  ;;  %v794_v54 = vor.u32 %v879_v52, %v791_v53  ;;  %v877_v56 = vld [vmem:[%s1350_s1 + $0x14] sm:$0xf]  ;;  %v783_v57 = vld [vmem:[%s1350_s1 + $0x18] sm:$0xf0]  ;;  %v892_v59 = vld [vmem:[%s1353_s3 + $0x8] sm:$0xff] }
  0x10   :  { %262 = vmatpush.bf16.msra.mxu0 %v806_v11  ;;  %949 = vmatpush.bf16.msra.mxu3 %v806_v11  ;;  %v786_v58 = vor.u32 %v877_v56, %v783_v57  ;;  %v875_v60 = vld [vmem:[%s1350_s1 + $0x4] sm:$0xf]  ;;  %v775_v61 = vld [vmem:[%s1350_s1 + $0x8] sm:$0xf0]  ;;  %v1187_v1 = vld [vmem:[%s1351_s4] ss:$0 sm:$0xff] }
  0x11   :  { %309 = vmatpush.bf16.msra.mxu1 %v826_v37  ;;  %v778_v62 = vor.u32 %v875_v60, %v775_v61  ;;  %v891_v63 = vld [vmem:[%s1353_s3] sm:$0xff]  ;;  %v529_v4 = vld [vmem:[%s1355_s2 + $0x8] sm:$0xff]  ;;  %v542_v48 = vld [vmem:[%s1355_s2 + $0x70] sm:$0xff] }
  0x12   :  { %v528_v3 = vld [vmem:[%s1355_s2] sm:$0xff]  ;;  %v545_v9 = vmul.f32 0.5, %v529_v4  ;;  %v541_v31 = vld [vmem:[%s1355_s2 + $0x68] sm:$0xff] }
  0x13   :  { %650 = vmatpush.bf16.msra.mxu2 %v896_v40  ;;  %v544_v7 = vmul.f32 0.5, %v528_v3  ;;  %v540_v19 = vld [vmem:[%s1355_s2 + $0x60] sm:$0xff]  ;;  %v557_v35 = vmul.f32 0.5, %v541_v31 }
  0x14   :  { %263 = vmatpush.bf16.msra.mxu0 %v798_v14  ;;  %950 = vmatpush.bf16.msra.mxu3 %v798_v14  ;;  %v556_v22 = vmul.f32 0.5, %v540_v19  ;;  %v536_v19 = vld [vmem:[%s1355_s2 + $0x40] sm:$0xff] }
  0x15   :  { %310 = vmatpush.bf16.msra.mxu1 %v818_v41 }
  0x17   :  { %651 = vmatpush.bf16.msra.mxu2 %v895_v44 }
  0x18   :  { %264 = vmatpush.bf16.msra.mxu0 %v790_v17  ;;  %951 = vmatpush.bf16.msra.mxu3 %v790_v17  ;;  %v530_v17 = vld [vmem:[%s1355_s2 + $0x10] sm:$0xff] }
  0x19   :  { %311 = vmatpush.bf16.msra.mxu1 %v810_v45 }
  0x1b   :  { %652 = vmatpush.bf16.msra.mxu2 %v894_v51 }
  0x1c   :  { %265 = vmatpush.bf16.msra.mxu0 %v782_v20  ;;  %952 = vmatpush.bf16.msra.mxu3 %v782_v20  ;;  %v531_v20 = vld [vmem:[%s1355_s2 + $0x18] sm:$0xff] }
  0x1d   :  { %312 = vmatpush.bf16.msra.mxu1 %v802_v50 }
  0x1f   :  { %653 = vmatpush.bf16.msra.mxu2 %v893_v55 }
  0x20   :  { %266 = vmatpush.bf16.msra.mxu0 %v774_v23  ;;  %953 = vmatpush.bf16.msra.mxu3 %v774_v23  ;;  %v546_v23 = vmul.f32 0.5, %v530_v17 }
  0x21   :  { %313 = vmatpush.bf16.msra.mxu1 %v794_v54 }
  0x23   :  { %267 = vmatmul.bf16.vlgmr.msra.gmra.mxu0 %v1063_v24  ;;  %297 = vmatmul.bf16.vlgmr.msra.gmra.mxu3 %v1069_v25 }
  0x24   :  { %954 = vmatpush.bf16.msrb.mxu3 %v834_v33  ;;  %654 = vmatpush.bf16.msra.mxu2 %v892_v59 }
  0x25   :  { %314 = vmatpush.bf16.msra.mxu1 %v786_v58 }
  0x28   :  { %955 = vmatpush.bf16.msrb.mxu3 %v826_v37  ;;  %655 = vmatpush.bf16.msra.mxu2 %v891_v63 }
  0x29   :  { %315 = vmatpush.bf16.msra.mxu1 %v778_v62 }
  0x2c   :  { %956 = vmatpush.bf16.msrb.mxu3 %v818_v41  ;;  %316 = vmatmul.bf16.vlgmr.msra.gmra.mxu1 %v1063_v24 }
  0x30   :  { %957 = vmatpush.bf16.msrb.mxu3 %v810_v45 }
  0x33   :  { %272 = vmatmul.bf16.gmra.mxu0 %v1075_v26  ;;  %302 = vmatmul.bf16.gmra.mxu3 %v1081_v27 }
  0x34   :  { %958 = vmatpush.bf16.msrb.mxu3 %v802_v50  ;;  %v558_v50 = vmul.f32 0.5, %v542_v48 }
  0x38   :  { %959 = vmatpush.bf16.msrb.mxu3 %v794_v54 }
  0x3c   :  { %960 = vmatpush.bf16.msrb.mxu3 %v786_v58  ;;  %321 = vmatmul.bf16.gmra.mxu1 %v1075_v26  ;;  %v543_v58 = vld [vmem:[%s1355_s2 + $0x78] sm:$0xff] }
  0x40   :  { %961 = vmatpush.bf16.msrb.mxu3 %v778_v62  ;;  %v559_v62 = vmul.f32 0.5, %v543_v58 }
  0x43   :  { %277 = vmatmul.bf16.gmra.mxu0 %v1087_v28  ;;  %346 = vmatmul.bf16.vlgmr.msrb.gmra.mxu3 %v1069_v25 }
  0x44   :  { %962 = vmatpush.bf16.msra.mxu3 %v898_v32 }
  0x48   :  { %963 = vmatpush.bf16.msra.mxu3 %v897_v36 }
  0x4c   :  { %964 = vmatpush.bf16.msra.mxu3 %v896_v40  ;;  %326 = vmatmul.bf16.gmra.mxu1 %v1087_v28  ;;  %v547_v28 = vmul.f32 0.5, %v531_v20  ;;  %v537_v20 = vld [vmem:[%s1355_s2 + $0x48] sm:$0xff] }
  0x50   :  { %965 = vmatpush.bf16.msra.mxu3 %v895_v44  ;;  %v532_v44 = vld [vmem:[%s1355_s2 + $0x20] sm:$0xff] }
  0x53   :  { %282 = vmatmul.bf16.gmra.mxu0 %v1093_v29  ;;  %351 = vmatmul.bf16.gmra.mxu3 %v1081_v27 }
  0x54   :  { %966 = vmatpush.bf16.msra.mxu3 %v894_v51  ;;  %v548_v51 = vmul.f32 0.5, %v532_v44 }
  0x58   :  { %967 = vmatpush.bf16.msra.mxu3 %v893_v55 }
  0x5c   :  { %968 = vmatpush.bf16.msra.mxu3 %v892_v59  ;;  %331 = vmatmul.bf16.gmra.mxu1 %v1093_v29  ;;  %v533_v29 = vld [vmem:[%s1355_s2 + $0x28] sm:$0xff] }
  0x5d   :  { %v549_v56 = vmul.f32 0.5, %v533_v29 }
  0x60   :  { %969 = vmatpush.bf16.msra.mxu3 %v891_v63 }
  0x63   :  { %287 = vmatmul.bf16.gmra.mxu0 %v1135_v46 }
  0x6c   :  { %336 = vmatmul.bf16.gmra.mxu1 %v1135_v46 }
  0x73   :  { %292 = vmatmul.bf16.gmra.mxu0 %v1141_v47 }
  0x7c   :  { %341 = vmatmul.bf16.gmra.mxu1 %v1141_v47 }
  0xa0   :  { %v268_v0 = vpop.f32.mrf.mxu0 }
  0xa1   :  { %v460_v2 = vadd.f32 %v1187_v1, %v268_v0 }
  0xa3   :  { %v512_v6 = vmul.f32 0.5, %v460_v2 }
  0xa5   :  { %v560_v11 = vadd.f32 %v544_v7, %v512_v6  ;;  %v534_v7 = vld [vmem:[%s1355_s2 + $0x30] sm:$0xff] }
  0xa6   :  { %v298_v15 = vpop.f32.mrf.mxu3 }
  0xa7   :  { %v472_v18 = vadd.f32 %v1187_v1, %v298_v15 }
  0xa8   :  { %v270_v5 = vpop.f32.mrf.mxu0 }
  0xa9   :  { %v461_v8 = vadd.f32 %v1187_v1, %v270_v5  ;;  %v524_v21 = vmul.f32 0.5, %v472_v18  ;;  %v317_v44 = vpop.f32.mrf.mxu1 }
  0xab   :  { %v513_v10 = vmul.f32 0.5, %v461_v8  ;;  %v572_v33 = vadd.f32 %v556_v22, %v524_v21  ;;  %v535_v8 = vld [vmem:[%s1355_s2 + $0x38] sm:$0xff] }
  0xac   :  { %v551_v46 = vmul.f32 0.5, %v535_v8 }
  0xad   :  { %v561_v12 = vadd.f32 %v545_v9, %v513_v10 }
  0xae   :  { %v300_v25 = vpop.f32.mrf.mxu3 }
  0xaf   :  { %v576_v13 = vpack.c.bf16 %v561_v12, %v560_v11  ;;  %v473_v30 = vadd.f32 %v1187_v1, %v300_v25  ;;  %v550_v11 = vmul.f32 0.5, %v534_v7  ;;  %v553_v25 = vmul.f32 0.5, %v537_v20 }
  0xb0   :  { %v273_v14 = vpop.f32.mrf.mxu0 }
  0xb1   :  { %656 = vmatmul.bf16.vlgmr.msra.gmra.mxu2 %v576_v13  ;;  %v462_v16 = vadd.f32 %v1187_v1, %v273_v14  ;;  %v525_v34 = vmul.f32 0.5, %v473_v30  ;;  %v319_v48 = vpop.f32.mrf.mxu1 }
  0xb3   :  { %v514_v26 = vmul.f32 0.5, %v462_v16  ;;  %v573_v38 = vadd.f32 %v557_v35, %v525_v34 }
  0xb5   :  { %v562_v36 = vadd.f32 %v546_v23, %v514_v26  ;;  %v582_v40 = vpack.c.bf16 %v573_v38, %v572_v33  ;;  %v552_v23 = vmul.f32 0.5, %v536_v19  ;;  %v539_v33 = vld [vmem:[%s1355_s2 + $0x58] sm:$0xff] }
  0xb6   :  { %v303_v42 = vpop.f32.mrf.mxu3  ;;  %v555_v38 = vmul.f32 0.5, %v539_v33 }
  0xb7   :  { %686 = vmatmul.bf16.vlgmr.msra.gmra.mxu3 %v582_v40  ;;  %v474_v45 = vadd.f32 %v1187_v1, %v303_v42 }
  0xb8   :  { %v275_v24 = vpop.f32.mrf.mxu0 }
  0xb9   :  { %v463_v27 = vadd.f32 %v1187_v1, %v275_v24  ;;  %v526_v49 = vmul.f32 0.5, %v474_v45  ;;  %v322_v29 = vpop.f32.mrf.mxu1 }
  0xbb   :  { %v515_v32 = vmul.f32 0.5, %v463_v27  ;;  %v574_v60 = vadd.f32 %v558_v50, %v526_v49 }
  0xbd   :  { %v563_v37 = vadd.f32 %v547_v28, %v515_v32  ;;  %v538_v32 = vld [vmem:[%s1355_s2 + $0x50] sm:$0xff] }
  0xbe   :  { %v305_v53 = vpop.f32.mrf.mxu3 }
  0xbf   :  { %v577_v39 = vpack.c.bf16 %v563_v37, %v562_v36  ;;  %v475_v57 = vadd.f32 %v1187_v1, %v305_v53  ;;  %v554_v36 = vmul.f32 0.5, %v538_v32 }
  0xc0   :  { %v278_v41 = vpop.f32.mrf.mxu0 }
  0xc1   :  { %661 = vmatmul.bf16.gmra.mxu2 %v577_v39  ;;  %v464_v43 = vadd.f32 %v1187_v1, %v278_v41  ;;  %v527_v61 = vmul.f32 0.5, %v475_v57 }
  0xc3   :  { %v516_v54 = vmul.f32 0.5, %v464_v43  ;;  %v575_v2 = vadd.f32 %v559_v62, %v527_v61  ;;  %v1260_v43 = vld [vmem:[%s1354_s5] ss:$0 sm:$0xff] }
  0xc4   :  { %v480_v45 = vadd.f32 %v1260_v43, %v317_v44  ;;  %v482_v49 = vadd.f32 %v1260_v43, %v322_v29 }
  0xc5   :  { %v564_v63 = vadd.f32 %v548_v51, %v516_v54  ;;  %v583_v4 = vpack.c.bf16 %v575_v2, %v574_v60 }
  0xc6   :  { %496 = vst [vmem:[%s1356_s6] sm:$0xff] %v480_v45  ;;  %v347_v50 = vpop.f32.mrf.mxu3 }
  0xc7   :  { %691 = vmatmul.bf16.gmra.mxu3 %v583_v4  ;;  %498 = vst [vmem:[%s1356_s6 + $0x10] sm:$0xff] %v482_v49  ;;  %v492_v51 = vadd.f32 %v1260_v43, %v347_v50 }
  0xc8   :  { %v280_v52 = vpop.f32.mrf.mxu0 }
  0xc9   :  { %v465_v55 = vadd.f32 %v1187_v1, %v280_v52  ;;  %508 = vst [vmem:[%s1356_s6 + $0x60] sm:$0xff] %v492_v51  ;;  %v324_v52 = vpop.f32.mrf.mxu1 }
  0xca   :  { %v483_v53 = vadd.f32 %v1260_v43, %v324_v52 }
  0xcb   :  { %v517_v59 = vmul.f32 0.5, %v465_v55 }
  0xcc   :  { %499 = vst [vmem:[%s1356_s6 + $0x18] sm:$0xff] %v483_v53 }
  0xcd   :  { %v565_v0 = vadd.f32 %v549_v56, %v517_v59 }
  0xce   :  { %v349_v54 = vpop.f32.mrf.mxu3 }
  0xcf   :  { %v578_v3 = vpack.c.bf16 %v565_v0, %v564_v63  ;;  %v493_v55 = vadd.f32 %v1260_v43, %v349_v54 }
  0xd0   :  { %v283_v5 = vpop.f32.mrf.mxu0 }
  0xd1   :  { %666 = vmatmul.bf16.gmra.mxu2 %v578_v3  ;;  %v466_v6 = vadd.f32 %v1187_v1, %v283_v5  ;;  %509 = vst [vmem:[%s1356_s6 + $0x68] sm:$0xff] %v493_v55  ;;  %v327_v56 = vpop.f32.mrf.mxu1 }
  0xd2   :  { %v484_v57 = vadd.f32 %v1260_v43, %v327_v56 }
  0xd3   :  { %v518_v10 = vmul.f32 0.5, %v466_v6 }
  0xd4   :  { %500 = vst [vmem:[%s1356_s6 + $0x20] sm:$0xff] %v484_v57 }
  0xd5   :  { %v566_v14 = vadd.f32 %v550_v11, %v518_v10 }
  0xd6   :  { %v352_v58 = vpop.f32.mrf.mxu3 }
  0xd7   :  { %v494_v59 = vadd.f32 %v1260_v43, %v352_v58 }
  0xd8   :  { %v285_v9 = vpop.f32.mrf.mxu0 }
  0xd9   :  { %v467_v12 = vadd.f32 %v1187_v1, %v285_v9  ;;  %510 = vst [vmem:[%s1356_s6 + $0x70] sm:$0xff] %v494_v59  ;;  %v329_v61 = vpop.f32.mrf.mxu1 }
  0xda   :  { %v485_v62 = vadd.f32 %v1260_v43, %v329_v61 }
  0xdb   :  { %v519_v13 = vmul.f32 0.5, %v467_v12 }
  0xdc   :  { %501 = vst [vmem:[%s1356_s6 + $0x28] sm:$0xff] %v485_v62 }
  0xdd   :  { %v567_v15 = vadd.f32 %v551_v46, %v519_v13 }
  0xde   :  { %v354_v63 = vpop.f32.mrf.mxu3 }
  0xdf   :  { %v579_v16 = vpack.c.bf16 %v567_v15, %v566_v14  ;;  %v495_v0 = vadd.f32 %v1260_v43, %v354_v63 }
  0xe0   :  { %v288_v17 = vpop.f32.mrf.mxu0 }
  0xe1   :  { %671 = vmatmul.bf16.gmra.mxu2 %v579_v16  ;;  %v468_v18 = vadd.f32 %v1187_v1, %v288_v17  ;;  %511 = vst [vmem:[%s1356_s6 + $0x78] sm:$0xff] %v495_v0  ;;  %v332_v3 = vpop.f32.mrf.mxu1 }
  0xe2   :  { %v486_v5 = vadd.f32 %v1260_v43, %v332_v3 }
  0xe3   :  { %v520_v22 = vmul.f32 0.5, %v468_v18 }
  0xe4   :  { %502 = vst [vmem:[%s1356_s6 + $0x30] sm:$0xff] %v486_v5 }
  0xe5   :  { %v568_v47 = vadd.f32 %v552_v23, %v520_v22 }
  0xe8   :  { %v290_v21 = vpop.f32.mrf.mxu0 }
  0xe9   :  { %v469_v24 = vadd.f32 %v1187_v1, %v290_v21  ;;  %v334_v7 = vpop.f32.mrf.mxu1 }
  0xea   :  { %v487_v8 = vadd.f32 %v1260_v43, %v334_v7 }
  0xeb   :  { %v521_v26 = vmul.f32 0.5, %v469_v24 }
  0xec   :  { %503 = vst [vmem:[%s1356_s6 + $0x38] sm:$0xff] %v487_v8 }
  0xed   :  { %v569_v27 = vadd.f32 %v553_v25, %v521_v26 }
  0xef   :  { %v580_v28 = vpack.c.bf16 %v569_v27, %v568_v47 }
  0xf0   :  { %v293_v30 = vpop.f32.mrf.mxu0 }
  0xf1   :  { %676 = vmatmul.bf16.gmra.mxu2 %v580_v28  ;;  %v470_v31 = vadd.f32 %v1187_v1, %v293_v30  ;;  %v337_v11 = vpop.f32.mrf.mxu1 }
  0xf2   :  { %v488_v46 = vadd.f32 %v1260_v43, %v337_v11 }
  0xf3   :  { %v522_v35 = vmul.f32 0.5, %v470_v31 }
  0xf4   :  { %504 = vst [vmem:[%s1356_s6 + $0x40] sm:$0xff] %v488_v46 }
  0xf5   :  { %v570_v40 = vadd.f32 %v554_v36, %v522_v35 }
  0xf8   :  { %v295_v34 = vpop.f32.mrf.mxu0 }
  0xf9   :  { %v471_v37 = vadd.f32 %v1187_v1, %v295_v34  ;;  %v481_v1 = vadd.f32 %v1260_v43, %v319_v48  ;;  %v339_v16 = vpop.f32.mrf.mxu1 }
  0xfa   :  { %v489_v17 = vadd.f32 %v1260_v43, %v339_v16 }
  0xfb   :  { %v523_v39 = vmul.f32 0.5, %v471_v37  ;;  %497 = vst [vmem:[%s1356_s6 + $0x8] sm:$0xff] %v481_v1 }
  0xfc   :  { %505 = vst [vmem:[%s1356_s6 + $0x48] sm:$0xff] %v489_v17 }
  0xfd   :  { %v571_v41 = vadd.f32 %v555_v38, %v523_v39 }
  0xff   :  { %v581_v42 = vpack.c.bf16 %v571_v41, %v570_v40 }
 0x101   :  { %681 = vmatmul.bf16.gmra.mxu2 %v581_v42  ;;  %v342_v20 = vpop.f32.mrf.mxu1 }
 0x102   :  { %v490_v22 = vadd.f32 %v1260_v43, %v342_v20 }
 0x104   :  { %506 = vst [vmem:[%s1356_s6 + $0x50] sm:$0xff] %v490_v22 }
 0x109   :  { %v344_v26 = vpop.f32.mrf.mxu1 }
 0x10a   :  { %v491_v47 = vadd.f32 %v1260_v43, %v344_v26 }
 0x10c   :  { %507 = vst [vmem:[%s1356_s6 + $0x58] sm:$0xff] %v491_v47 }
 0x134   :  { %v657_v60 = vpop.f32.mrf.mxu2 }
 0x13a   :  { %v687_v9 = vpop.f32.mrf.mxu3 }
 0x13c   :  { %v659_v2 = vpop.f32.mrf.mxu2 }
 0x13d   :  { %v902_v4 = vpack.c.bf16 %v659_v2, %v657_v60 }
 0x13f   :  { %903 = vst [vmem:[%s1357_s7] sm:$0xff] %v902_v4  }
 0x142   :  { %v689_v13 = vpop.f32.mrf.mxu3 }
 0x143   :  { %v932_v14 = vpack.c.bf16 %v689_v13, %v687_v9 }
 0x144   :  { %v662_v6 = vpop.f32.mrf.mxu2 }
 0x145   :  { %944 = vst [vmem:[%s1357_s7 + $0x30] sm:$0xff] %v932_v14  }
 0x14a   :  { %v692_v18 = vpop.f32.mrf.mxu3 }
 0x14c   :  { %v664_v10 = vpop.f32.mrf.mxu2 }
 0x14d   :  { %v907_v12 = vpack.c.bf16 %v664_v10, %v662_v6 }
 0x14f   :  { %939 = vst [vmem:[%s1357_s7 + $0x8] sm:$0xff] %v907_v12  }
 0x152   :  { %v694_v23 = vpop.f32.mrf.mxu3 }
 0x153   :  { %v937_v24 = vpack.c.bf16 %v694_v23, %v692_v18 }
 0x154   :  { %v667_v15 = vpop.f32.mrf.mxu2 }
 0x155   :  { %945 = vst [vmem:[%s1357_s7 + $0x38] sm:$0xff] %v937_v24  }
 0x15c   :  { %v669_v19 = vpop.f32.mrf.mxu2 }
 0x15d   :  { %v912_v21 = vpack.c.bf16 %v669_v19, %v667_v15 }
 0x15f   :  { %940 = vst [vmem:[%s1357_s7 + $0x10] sm:$0xff] %v912_v21  }
 0x164   :  { %v672_v25 = vpop.f32.mrf.mxu2 }
 0x16c   :  { %v674_v27 = vpop.f32.mrf.mxu2 }
 0x16d   :  { %v917_v28 = vpack.c.bf16 %v674_v27, %v672_v25 }
 0x16f   :  { %941 = vst [vmem:[%s1357_s7 + $0x18] sm:$0xff] %v917_v28  }
 0x174   :  { %v677_v30 = vpop.f32.mrf.mxu2 }
 0x17c   :  { %v679_v31 = vpop.f32.mrf.mxu2 }
 0x17d   :  { %v922_v32 = vpack.c.bf16 %v679_v31, %v677_v30 }
 0x17f   :  { %942 = vst [vmem:[%s1357_s7 + $0x20] sm:$0xff] %v922_v32  }
 0x184   :  { %v682_v33 = vpop.f32.mrf.mxu2 }
 0x18c   :  { %v684_v34 = vpop.f32.mrf.mxu2 }
 0x18d   :  { %v927_v35 = vpack.c.bf16 %v684_v34, %v682_v33 }
 0x18f   :  { %943 = vst [vmem:[%s1357_s7 + $0x28] sm:$0xff] %v927_v35  }

</bundles_post_ra>
